<compile_context>
chip_gen: v7x
topology: tpu7x:2x2x1
jax: 0.10.0
libtpu: 0.0.40
codegen_flags: <defaults>
</compile_context>

<pallas_src>
import functools

import jax
import jax.numpy as jnp
from jax import lax
from jax.experimental import pallas as pl
from jax.experimental.pallas import tpu as pltpu


# Sublane-aligned left/right border width for the h0 staging buffer.
_WPAD = 8


def _round_up(x, m):
    return (x + m - 1) // m * m


def _pick_row_tile(oh, requested):
    t = min(oh, 16) if requested is None else max(1, min(int(requested), oh))
    while oh % t:
        t -= 1
    return t


# --------------------------------------------------------------------------
# Fused Pallas kernel: one grid step == one (image, row-tile).
# --------------------------------------------------------------------------
def _resblock_down_kernel(p_ref, w02_ref, b02_ref, w1_ref, b1_ref,
                          o_ref, h0pad_ref, acc_ref):
    """y = relu(conv2(x) + conv1(relu(conv0(x)))) for one output row tile.

    p_ref     : (1, 1, t_oh+2, ow, K)  stride-2 im2col patches (with 1-row halo)
    w02_ref   : (K, 2*Cp)              [w0 | w2] flattened (compute dtype)
    b02_ref   : (1, 2*Cp)              [b0 | b2]            (f32)
    w1_ref    : (9, Cp, Cp)            conv1 taps, (kh,kw) major, [cin, cout]
    b1_ref    : (1, Cp)                (f32)
    o_ref     : (1, t_oh, ow, c_out)   only real channels are written back
    h0pad_ref : (t_oh+2, ow+2*_WPAD, Cp) f32 zero-bordered h0 staging (VMEM)
    acc_ref   : (t_oh*ow, Cp)          f32 conv1/residual accumulator (VMEM)
    """
    t_oh, ow, c_out = o_ref.shape[1], o_ref.shape[2], o_ref.shape[3]
    cp = w1_ref.shape[-1]
    k0 = p_ref.shape[-1]
    rows = t_oh + 2                         # output rows incl. 1-row halo
    bw = ow + 2 * _WPAD                     # staged row width
    cdt = p_ref.dtype                       # compute dtype (bf16 or f32)
    tile = pl.program_id(1)

    # ---- conv0 | conv2 as ONE GEMM over the shared stride-2 patch tile -----
    p = p_ref[...].reshape(rows * ow, k0)
    z = jnp.dot(p, w02_ref[...], preferred_element_type=jnp.float32)
    z = z + b02_ref[...]
    h0 = jnp.maximum(z[:, :cp], 0.0)                  # relu(conv0), halo rows too
    skip = z[ow:(t_oh + 1) * ow, cp:]                 # conv2, interior rows only

    # ---- stage h0 into the zero-bordered VMEM buffer ------------------------
    # Border columns are re-zeroed every step (tiny aligned stores; correct
    # regardless of how the parallel grid is split across TensorCores).
    h0pad_ref[:, 0:_WPAD, :] = jnp.zeros((rows, _WPAD, cp), jnp.float32)
    h0pad_ref[:, _WPAD + ow:, :] = jnp.zeros((rows, _WPAD, cp), jnp.float32)
    h0pad_ref[:, _WPAD:_WPAD + ow, :] = h0.reshape(rows, ow, cp)

    # Top/bottom halo rows hold real neighbour rows for interior tiles; they
    # are conv1's zero padding only at the image edges.
    @pl.when(tile == 0)
    def _():
        h0pad_ref[0:1, _WPAD:_WPAD + ow, :] = jnp.zeros((1, ow, cp), jnp.float32)

    @pl.when(tile == pl.num_programs(1) - 1)
    def _():
        h0pad_ref[rows - 1:rows, _WPAD:_WPAD + ow, :] = jnp.zeros(
            (1, ow, cp), jnp.float32)

    # ---- conv1: 9 shifted-window taps into a VMEM scratch accumulator -------
    acc_ref[...] = skip + b1_ref[...]                 # residual + conv1 bias
    for kh in range(3):
        # Aligned load of the full-width row band (staging stays f32 so the
        # sublane rotate below runs on native (8,128) layout).
        band = h0pad_ref[kh:kh + t_oh, :, :].reshape(t_oh * bw, cp)
        for kw in range(3):
            # +/-1 column shifts via an XLU sublane rotate; the zero border
            # columns make the wrap-around harmless and the final slice starts
            # on an 8-sublane boundary (no unaligned relayout copies).
            sh = band if kw == 1 else pltpu.roll(
                band, shift=(1 - kw) % (t_oh * bw), axis=0)
            win = sh.reshape(t_oh, bw, cp)[:, _WPAD:_WPAD + ow, :]
            win = win.reshape(t_oh * ow, cp).astype(cdt)
            acc_ref[...] += jnp.dot(win, w1_ref[kh * 3 + kw],
                                    preferred_element_type=jnp.float32)

    # ---- final relu; store only the real channels ----------------------------
    y = jnp.maximum(acc_ref[...], 0.0)[:, :c_out]
    o_ref[0] = y.reshape(t_oh, ow, c_out).astype(o_ref.dtype)


# --------------------------------------------------------------------------
# Glue (plain JAX): layout conversion, im2col for the strided input path.
# --------------------------------------------------------------------------
def _im2col(x_nhwc, ks, stride, pad):
    """(N,H,W,C) -> (N, OH, OW, ks*ks*C), patch index order (kh, kw, c)."""
    xp = jnp.pad(x_nhwc, ((0, 0), (pad, pad), (pad, pad), (0, 0)))
    _, hp, wp, _ = xp.shape
    oh = (hp - ks) // stride + 1
    ow = (wp - ks) // stride + 1
    cols = []
    for kh in range(ks):
        for kw in range(ks):
            cols.append(xp[:, kh:kh + stride * oh:stride,
                           kw:kw + stride * ow:stride, :])
    return jnp.concatenate(cols, axis=-1), (oh, ow)


def _flatten_weight(w_oihw):
    """OIHW -> (ks*ks*Cin, Cout), row index order (kh, kw, cin)."""
    w = jnp.transpose(w_oihw, (2, 3, 1, 0))        # (kh, kw, cin, cout)
    kh, kw, cin, cout = w.shape
    return w.reshape(kh * kw * cin, cout)


# --------------------------------------------------------------------------
# Forward pass
# --------------------------------------------------------------------------
@functools.partial(jax.jit,
                   static_argnames=("conv_size", "compute_dtype", "row_tile"))
def resblock_down(x_nchw, params, conv_size=3, *,
                  compute_dtype=jnp.bfloat16, row_tile=None):
    assert conv_size == 3, "ResBlock_down residual add requires 3x3 convs"
    w0, b0, w1, b1, w2, b2 = params
    c_out, c_in = w0.shape[0], w0.shape[1]
    n = x_nchw.shape[0]

    # TODO(synk): keep activations NHWC end-to-end across res-blocks so these
    # two full-HBM relayout transposes disappear.
    x_nhwc = jnp.transpose(x_nchw, (0, 2, 3, 1)).astype(compute_dtype)

    # ONE stride-2/pad-1 im2col shared by conv0 and conv2 (bf16 -> half HBM).
    # TODO(synk): move this im2col into the kernel (strided-window matmuls on
    # an NHWC halo block) to remove the 2.25x HBM expansion entirely.
    patches, (oh, ow) = _im2col(x_nhwc, conv_size, stride=2, pad=1)
    k0 = conv_size * conv_size * c_in              # contraction dim, NOT padded
    cp = _round_up(c_out, 128)                     # lane-dense compute channels

    # Row-tiling with a 1-row halo (conv1 needs the neighbouring h0 rows).
    t_oh = _pick_row_tile(oh, row_tile)
    n_t = oh // t_oh
    pad_p = jnp.pad(patches, ((0, 0), (1, 1), (0, 0), (0, 0)))
    p_tiles = jnp.stack(
        [pad_p[:, t * t_oh:t * t_oh + t_oh + 2] for t in range(n_t)],
        axis=1)                                    # (n, n_t, t_oh+2, ow, k0)

    # conv0 | conv2 weights concatenated along the output dim.
    w0f = jnp.pad(_flatten_weight(w0), ((0, 0), (0, cp - c_out)))
    w2f = jnp.pad(_flatten_weight(w2), ((0, 0), (0, cp - c_out)))
    w02 = jnp.concatenate([w0f, w2f], axis=1).astype(compute_dtype)  # (k0, 2cp)
    b02 = jnp.concatenate([
        jnp.pad(b0.astype(jnp.float32), (0, cp - c_out)),
        jnp.pad(b2.astype(jnp.float32), (0, cp - c_out)),
    ]).reshape(1, 2 * cp)

    # conv1 taps: (9, cp, cp), each a [cin, cout] matrix per (kh, kw).
    # TODO(synk): for tiny c_out, a weights-stationary formulation with the
    # spatial dim on lanes would avoid the (128/c_out)^2 padded-FLOP waste.
    w1t = jnp.transpose(w1, (2, 3, 1, 0))
    w1t = jnp.pad(w1t, ((0, 0), (0, 0), (0, cp - c_out), (0, cp - c_out)))
    w1t = w1t.reshape(conv_size * conv_size, cp, cp).astype(compute_dtype)
    b1r = jnp.pad(b1.astype(jnp.float32), (0, cp - c_out)).reshape(1, cp)

    # VMEM budget from the actual block sizes (double-buffered I/O + scratch).
    # TODO(synk): single-buffer the grid-invariant weight blocks
    # (pipeline_mode=pl.Buffered(1)) to reclaim more VMEM on v7x.
    isz = jnp.dtype(compute_dtype).itemsize
    patch_blk = (t_oh + 2) * ow * k0 * isz
    out_blk = t_oh * ow * c_out * 4
    wgt_blk = (k0 * 2 * cp + 9 * cp * cp) * isz + 3 * cp * 4
    scratch = (t_oh + 2) * (ow + 2 * _WPAD) * cp * 4 + t_oh * ow * cp * 4
    need = 2 * (patch_blk + out_blk + wgt_blk) + scratch
    vmem_limit = int(min(64 * 2 ** 20, max(2 * need, 32 * 2 ** 20)))

    m_halo = n * n_t * (t_oh + 2) * ow
    m_out = n * oh * ow
    flops = 2 * m_halo * k0 * (2 * cp) + 2 * 9 * m_out * cp * cp
    bytes_accessed = (isz * (m_halo * k0 + k0 * 2 * cp + 9 * cp * cp)
                      + 4 * 3 * cp + 4 * m_out * c_out)

    y = pl.pallas_call(
        _resblock_down_kernel,
        out_shape=jax.ShapeDtypeStruct((n, oh, ow, c_out), jnp.float32),
        grid_spec=pltpu.PrefetchScalarGridSpec(
            num_scalar_prefetch=0,
            grid=(n, n_t),
            in_specs=[
                pl.BlockSpec((1, 1, t_oh + 2, ow, k0),
                             lambda b, t: (b, t, 0, 0, 0)),
                pl.BlockSpec((k0, 2 * cp), lambda b, t: (0, 0)),
                pl.BlockSpec((1, 2 * cp), lambda b, t: (0, 0)),
                pl.BlockSpec((conv_size * conv_size, cp, cp),
                             lambda b, t: (0, 0, 0)),
                pl.BlockSpec((1, cp), lambda b, t: (0, 0)),
            ],
            out_specs=pl.BlockSpec((1, t_oh, ow, c_out),
                                   lambda b, t: (b, t, 0, 0)),
            scratch_shapes=[
                pltpu.VMEM((t_oh + 2, ow + 2 * _WPAD, cp), jnp.float32),
                pltpu.VMEM((t_oh * ow, cp), jnp.float32),
            ],
        ),
        compiler_params=pltpu.CompilerParams(
            dimension_semantics=("parallel", "parallel"),
            vmem_limit_bytes=vmem_limit),
        cost_estimate=pl.CostEstimate(
            flops=int(flops), transcendentals=0,
            bytes_accessed=int(bytes_accessed)),
    )(p_tiles, w02, b02, w1t, b1r)

    return jnp.transpose(y, (0, 3, 1, 2))            # NHWC -> NCHW


# --------------------------------------------------------------------------
# Pure-JAX reference (for correctness check)
# --------------------------------------------------------------------------
def _ref_forward(x, params):
    w0, b0, w1, b1, w2, b2 = params

    def conv(inp, w, b, stride):
        out = lax.conv_general_dilated(
            inp, w, (stride, stride), [(1, 1), (1, 1)],
            dimension_numbers=("NCHW", "OIHW", "NCHW"))
        return out + b[None, :, None, None]

    h0 = jnp.maximum(conv(x, w0, b0, 2), 0.0)
    y = conv(x, w2, b2, 2) + conv(h0, w1, b1, 1)
    return jnp.maximum(y, 0.0)


# --------------------------------------------------------------------------
if __name__ == "__main__":
    c_in, c_out, conv_size = 4, 8, 3
    n, h, w = 2, 16, 16

    key = jax.random.PRNGKey(0)
    k = jax.random.split(key, 7)
    x = jax.random.normal(k[0], (n, c_in, h, w), dtype=jnp.float32)

    # Deterministic synthetic parameters (PyTorch conv weight layout OIHW).
    w0 = 0.1 * jax.random.normal(k[1], (c_out, c_in, conv_size, conv_size), jnp.float32)
    b0 = 0.1 * jax.random.normal(k[2], (c_out,), jnp.float32)
    w1 = 0.1 * jax.random.normal(k[3], (c_out, c_out, conv_size, conv_size), jnp.float32)
    b1 = 0.1 * jax.random.normal(k[4], (c_out,), jnp.float32)
    w2 = 0.1 * jax.random.normal(k[5], (c_out, c_in, conv_size, conv_size), jnp.float32)
    b2 = 0.1 * jax.random.normal(k[6], (c_out,), jnp.float32)
    params = (w0, b0, w1, b1, w2, b2)

    y_ref = jax.block_until_ready(_ref_forward(x, params))

    # f32 compute path, 2 spatial tiles (exercises the halo logic) -> exact.
    y32 = jax.block_until_ready(
        resblock_down(x, params, conv_size=conv_size,
                      compute_dtype=jnp.float32, row_tile=4))
    assert y32.shape == (n, c_out, h // 2, w // 2), y32.shape
    err32 = float(jnp.max(jnp.abs(y32 - y_ref)))
    assert jnp.allclose(y32, y_ref, atol=1e-3, rtol=1e-3), err32

    # bf16 compute path (default perf config) -> bf16 input-rounding tolerance.
    ybf = jax.block_until_ready(
        resblock_down(x, params, conv_size=conv_size,
                      compute_dtype=jnp.bfloat16, row_tile=None))
    assert ybf.shape == (n, c_out, h // 2, w // 2), ybf.shape
    errbf = float(jnp.max(jnp.abs(ybf - y_ref)))
    assert jnp.allclose(ybf, y_ref, atol=1e-1, rtol=1e-1), errbf

    print("KERNEL_OK")
</pallas_src>

<mosaic_0001>
module attributes {stable_mosaic.version = 11 : i64} {
  func.func @_resblock_down_kernel(%arg0: i32, %arg1: i32, %arg2: memref<1x1x6x8x36xf32, #tpu.memory_space<vmem>>, %arg3: memref<36x256xf32, #tpu.memory_space<vmem>>, %arg4: memref<1x256xf32, #tpu.memory_space<vmem>>, %arg5: memref<9x128x128xf32, #tpu.memory_space<vmem>>, %arg6: memref<1x128xf32, #tpu.memory_space<vmem>>, %arg7: memref<1x4x8x8xf32, #tpu.memory_space<vmem>>, %arg8: memref<6x24x128xf32, #tpu.memory_space<vmem>>, %arg9: memref<32x128xf32, #tpu.memory_space<vmem>>) attributes {dimension_semantics = [#tpu.dimension_semantics<parallel>, #tpu.dimension_semantics<parallel>], iteration_bounds = array<i64: 2, 2>, scalar_prefetch = 0 : i64, scratch_operands = 2 : i64, tpu.core_type = #tpu.core_type<tc>, window_params = [{transform_indices = @transform_0, window_bounds = array<i64: 1, 1, 6, 8, 36>}, {pipeline_mode = #tpu.pipeline_mode<synchronous>, transform_indices = @transform_1, window_bounds = array<i64: 36, 256>}, {pipeline_mode = #tpu.pipeline_mode<synchronous>, transform_indices = @transform_2, window_bounds = array<i64: 1, 256>}, {pipeline_mode = #tpu.pipeline_mode<synchronous>, transform_indices = @transform_3, window_bounds = array<i64: 9, 128, 128>}, {pipeline_mode = #tpu.pipeline_mode<synchronous>, transform_indices = @transform_4, window_bounds = array<i64: 1, 128>}, {transform_indices = @transform_5, window_bounds = array<i64: 1, 4, 8, 8>}]} {
    %c0 = arith.constant 0 : index
    %c0_0 = arith.constant 0 : index
    %c0_1 = arith.constant 0 : index
    %c0_2 = arith.constant 0 : index
    %c0_3 = arith.constant 0 : index
    %0 = vector.load %arg2[%c0, %c0_0, %c0_1, %c0_2, %c0_3] : memref<1x1x6x8x36xf32, #tpu.memory_space<vmem>>, vector<1x1x6x8x36xf32>
    %1 = vector.shape_cast %0 : vector<1x1x6x8x36xf32> to vector<48x36xf32>
    %c0_4 = arith.constant 0 : index
    %c0_5 = arith.constant 0 : index
    %2 = vector.load %arg3[%c0_4, %c0_5] : memref<36x256xf32, #tpu.memory_space<vmem>>, vector<36x256xf32>
    %cst = arith.constant dense<0.000000e+00> : vector<48x256xf32>
    %3 = tpu.matmul %1, %2, %cst {dimension_numbers = #tpu.dot_dimension_numbers<[1], [0], [0], [1], [0, 0, 1, 1], [], []>} : vector<48x36xf32>, vector<36x256xf32>, vector<48x256xf32> -> vector<48x256xf32>
    %c0_6 = arith.constant 0 : index
    %c0_7 = arith.constant 0 : index
    %4 = vector.load %arg4[%c0_6, %c0_7] : memref<1x256xf32, #tpu.memory_space<vmem>>, vector<1x256xf32>
    %5 = vector.broadcast %4 : vector<1x256xf32> to vector<48x256xf32>
    %6 = arith.addf %3, %5 : vector<48x256xf32>
    %7 = vector.extract_strided_slice %6 {offsets = [0, 0], sizes = [48, 128], strides = [1, 1]} : vector<48x256xf32> to vector<48x128xf32>
    %cst_8 = arith.constant 0.000000e+00 : f32
    %8 = vector.broadcast %cst_8 : f32 to vector<48x128xf32>
    %9 = arith.maximumf %7, %8 : vector<48x128xf32>
    %10 = vector.extract_strided_slice %6 {offsets = [8, 128], sizes = [32, 128], strides = [1, 1]} : vector<48x256xf32> to vector<32x128xf32>
    %cst_9 = arith.constant 0.000000e+00 : f32
    %11 = vector.broadcast %cst_9 : f32 to vector<6x8x128xf32>
    %c0_10 = arith.constant 0 : index
    %c0_11 = arith.constant 0 : index
    %c0_12 = arith.constant 0 : index
    %12 = vector.load %arg8[%c0_10, %c0_11, %c0_12] : memref<6x24x128xf32, #tpu.memory_space<vmem>>, vector<6x8x128xf32>
    tpu.vector_store %arg8[%c0_10, %c0_11, %c0_12], %11 {strides = array<i32>} : memref<6x24x128xf32, #tpu.memory_space<vmem>>, vector<6x8x128xf32>,
    %cst_13 = arith.constant 0.000000e+00 : f32
    %13 = vector.broadcast %cst_13 : f32 to vector<6x8x128xf32>
    %c0_14 = arith.constant 0 : index
    %c16 = arith.constant 16 : index
    %c0_15 = arith.constant 0 : index
    %14 = vector.load %arg8[%c0_14, %c16, %c0_15] : memref<6x24x128xf32, #tpu.memory_space<vmem>>, vector<6x8x128xf32>
    tpu.vector_store %arg8[%c0_14, %c16, %c0_15], %13 {strides = array<i32>} : memref<6x24x128xf32, #tpu.memory_space<vmem>>, vector<6x8x128xf32>,
    %15 = vector.shape_cast %9 : vector<48x128xf32> to vector<6x8x128xf32>
    %c0_16 = arith.constant 0 : index
    %c8 = arith.constant 8 : index
    %c0_17 = arith.constant 0 : index
    %16 = vector.load %arg8[%c0_16, %c8, %c0_17] : memref<6x24x128xf32, #tpu.memory_space<vmem>>, vector<6x8x128xf32>
    tpu.vector_store %arg8[%c0_16, %c8, %c0_17], %15 {strides = array<i32>} : memref<6x24x128xf32, #tpu.memory_space<vmem>>, vector<6x8x128xf32>,
    %c0_i32 = arith.constant 0 : i32
    %17 = arith.cmpi eq, %arg1, %c0_i32 : i32
    %18 = arith.extui %17 : i1 to i32
    %c0_i32_18 = arith.constant 0 : i32
    %19 = arith.cmpi ne, %18, %c0_i32_18 : i32
    scf.if %19 {
      %cst_110 = arith.constant 0.000000e+00 : f32
      %128 = vector.broadcast %cst_110 : f32 to vector<1x8x128xf32>
      %c0_111 = arith.constant 0 : index
      %c8_112 = arith.constant 8 : index
      %c0_113 = arith.constant 0 : index
      %129 = vector.load %arg8[%c0_111, %c8_112, %c0_113] : memref<6x24x128xf32, #tpu.memory_space<vmem>>, vector<1x8x128xf32>
      tpu.vector_store %arg8[%c0_111, %c8_112, %c0_113], %128 {strides = array<i32>} : memref<6x24x128xf32, #tpu.memory_space<vmem>>, vector<1x8x128xf32>,
    } else {
    }
    %c1_i32 = arith.constant 1 : i32
    %20 = arith.cmpi eq, %arg1, %c1_i32 : i32
    %21 = arith.extui %20 : i1 to i32
    %c0_i32_19 = arith.constant 0 : i32
    %22 = arith.cmpi ne, %21, %c0_i32_19 : i32
    scf.if %22 {
      %cst_110 = arith.constant 0.000000e+00 : f32
      %128 = vector.broadcast %cst_110 : f32 to vector<1x8x128xf32>
      %c5_111 = arith.constant 5 : index
      %c8_112 = arith.constant 8 : index
      %c0_113 = arith.constant 0 : index
      %129 = vector.load %arg8[%c5_111, %c8_112, %c0_113] : memref<6x24x128xf32, #tpu.memory_space<vmem>>, vector<1x8x128xf32>
      tpu.vector_store %arg8[%c5_111, %c8_112, %c0_113], %128 {strides = array<i32>} : memref<6x24x128xf32, #tpu.memory_space<vmem>>, vector<1x8x128xf32>,
    } else {
    }
    %c0_20 = arith.constant 0 : index
    %c0_21 = arith.constant 0 : index
    %23 = vector.load %arg6[%c0_20, %c0_21] : memref<1x128xf32, #tpu.memory_space<vmem>>, vector<1x128xf32>
    %24 = vector.broadcast %23 : vector<1x128xf32> to vector<32x128xf32>
    %25 = arith.addf %10, %24 : vector<32x128xf32>
    %c0_22 = arith.constant 0 : index
    %c0_23 = arith.constant 0 : index
    %26 = vector.load %arg9[%c0_22, %c0_23] : memref<32x128xf32, #tpu.memory_space<vmem>>, vector<32x128xf32>
    tpu.vector_store %arg9[%c0_22, %c0_23], %25 {strides = array<i32>} : memref<32x128xf32, #tpu.memory_space<vmem>>, vector<32x128xf32>,
    %c0_24 = arith.constant 0 : index
    %c0_25 = arith.constant 0 : index
    %c0_26 = arith.constant 0 : index
    %27 = vector.load %arg8[%c0_24, %c0_25, %c0_26] : memref<6x24x128xf32, #tpu.memory_space<vmem>>, vector<4x24x128xf32>
    %28 = vector.shape_cast %27 : vector<4x24x128xf32> to vector<96x128xf32>
    %c1_i32_27 = arith.constant 1 : i32
    %29 = tpu.dynamic_rotate %28 by %c1_i32_27 dim 0 : vector<96x128xf32>, i32 -> vector<96x128xf32>
    %30 = vector.shape_cast %29 : vector<96x128xf32> to vector<4x24x128xf32>
    %31 = vector.extract_strided_slice %30 {offsets = [0, 8, 0], sizes = [4, 8, 128], strides = [1, 1, 1]} : vector<4x24x128xf32> to vector<4x8x128xf32>
    %32 = vector.shape_cast %31 : vector<4x8x128xf32> to vector<32x128xf32>
    %c0_28 = arith.constant 0 : index
    %c0_29 = arith.constant 0 : index
    %33 = vector.load %arg9[%c0_28, %c0_29] : memref<32x128xf32, #tpu.memory_space<vmem>>, vector<32x128xf32>
    %c0_30 = arith.constant 0 : index
    %c0_31 = arith.constant 0 : index
    %c0_32 = arith.constant 0 : index
    %34 = vector.load %arg5[%c0_30, %c0_31, %c0_32] : memref<9x128x128xf32, #tpu.memory_space<vmem>>, vector<1x128x128xf32>
    %35 = vector.shape_cast %34 : vector<1x128x128xf32> to vector<128x128xf32>
    %cst_33 = arith.constant dense<0.000000e+00> : vector<32x128xf32>
    %36 = tpu.matmul %32, %35, %cst_33 {dimension_numbers = #tpu.dot_dimension_numbers<[1], [0], [0], [1], [0, 0, 1, 1], [], []>} : vector<32x128xf32>, vector<128x128xf32>, vector<32x128xf32> -> vector<32x128xf32>
    %37 = arith.addf %33, %36 : vector<32x128xf32>
    %c0_34 = arith.constant 0 : index
    %c0_35 = arith.constant 0 : index
    %38 = vector.load %arg9[%c0_34, %c0_35] : memref<32x128xf32, #tpu.memory_space<vmem>>, vector<32x128xf32>
    tpu.vector_store %arg9[%c0_34, %c0_35], %37 {strides = array<i32>} : memref<32x128xf32, #tpu.memory_space<vmem>>, vector<32x128xf32>,
    %39 = vector.shape_cast %28 : vector<96x128xf32> to vector<4x24x128xf32>
    %40 = vector.extract_strided_slice %39 {offsets = [0, 8, 0], sizes = [4, 8, 128], strides = [1, 1, 1]} : vector<4x24x128xf32> to vector<4x8x128xf32>
    %41 = vector.shape_cast %40 : vector<4x8x128xf32> to vector<32x128xf32>
    %c0_36 = arith.constant 0 : index
    %c0_37 = arith.constant 0 : index
    %42 = vector.load %arg9[%c0_36, %c0_37] : memref<32x128xf32, #tpu.memory_space<vmem>>, vector<32x128xf32>
    %c1 = arith.constant 1 : index
    %c0_38 = arith.constant 0 : index
    %c0_39 = arith.constant 0 : index
    %43 = vector.load %arg5[%c1, %c0_38, %c0_39] : memref<9x128x128xf32, #tpu.memory_space<vmem>>, vector<1x128x128xf32>
    %44 = vector.shape_cast %43 : vector<1x128x128xf32> to vector<128x128xf32>
    %cst_40 = arith.constant dense<0.000000e+00> : vector<32x128xf32>
    %45 = tpu.matmul %41, %44, %cst_40 {dimension_numbers = #tpu.dot_dimension_numbers<[1], [0], [0], [1], [0, 0, 1, 1], [], []>} : vector<32x128xf32>, vector<128x128xf32>, vector<32x128xf32> -> vector<32x128xf32>
    %46 = arith.addf %42, %45 : vector<32x128xf32>
    %c0_41 = arith.constant 0 : index
    %c0_42 = arith.constant 0 : index
    %47 = vector.load %arg9[%c0_41, %c0_42] : memref<32x128xf32, #tpu.memory_space<vmem>>, vector<32x128xf32>
    tpu.vector_store %arg9[%c0_41, %c0_42], %46 {strides = array<i32>} : memref<32x128xf32, #tpu.memory_space<vmem>>, vector<32x128xf32>,
    %c95_i32 = arith.constant 95 : i32
    %48 = tpu.dynamic_rotate %28 by %c95_i32 dim 0 : vector<96x128xf32>, i32 -> vector<96x128xf32>
    %49 = vector.shape_cast %48 : vector<96x128xf32> to vector<4x24x128xf32>
    %50 = vector.extract_strided_slice %49 {offsets = [0, 8, 0], sizes = [4, 8, 128], strides = [1, 1, 1]} : vector<4x24x128xf32> to vector<4x8x128xf32>
    %51 = vector.shape_cast %50 : vector<4x8x128xf32> to vector<32x128xf32>
    %c0_43 = arith.constant 0 : index
    %c0_44 = arith.constant 0 : index
    %52 = vector.load %arg9[%c0_43, %c0_44] : memref<32x128xf32, #tpu.memory_space<vmem>>, vector<32x128xf32>
    %c2 = arith.constant 2 : index
    %c0_45 = arith.constant 0 : index
    %c0_46 = arith.constant 0 : index
    %53 = vector.load %arg5[%c2, %c0_45, %c0_46] : memref<9x128x128xf32, #tpu.memory_space<vmem>>, vector<1x128x128xf32>
    %54 = vector.shape_cast %53 : vector<1x128x128xf32> to vector<128x128xf32>
    %cst_47 = arith.constant dense<0.000000e+00> : vector<32x128xf32>
    %55 = tpu.matmul %51, %54, %cst_47 {dimension_numbers = #tpu.dot_dimension_numbers<[1], [0], [0], [1], [0, 0, 1, 1], [], []>} : vector<32x128xf32>, vector<128x128xf32>, vector<32x128xf32> -> vector<32x128xf32>
    %56 = arith.addf %52, %55 : vector<32x128xf32>
    %c0_48 = arith.constant 0 : index
    %c0_49 = arith.constant 0 : index
    %57 = vector.load %arg9[%c0_48, %c0_49] : memref<32x128xf32, #tpu.memory_space<vmem>>, vector<32x128xf32>
    tpu.vector_store %arg9[%c0_48, %c0_49], %56 {strides = array<i32>} : memref<32x128xf32, #tpu.memory_space<vmem>>, vector<32x128xf32>,
    %c1_50 = arith.constant 1 : index
    %c0_51 = arith.constant 0 : index
    %c0_52 = arith.constant 0 : index
    %58 = vector.load %arg8[%c1_50, %c0_51, %c0_52] : memref<6x24x128xf32, #tpu.memory_space<vmem>>, vector<4x24x128xf32>
    %59 = vector.shape_cast %58 : vector<4x24x128xf32> to vector<96x128xf32>
    %c1_i32_53 = arith.constant 1 : i32
    %60 = tpu.dynamic_rotate %59 by %c1_i32_53 dim 0 : vector<96x128xf32>, i32 -> vector<96x128xf32>
    %61 = vector.shape_cast %60 : vector<96x128xf32> to vector<4x24x128xf32>
    %62 = vector.extract_strided_slice %61 {offsets = [0, 8, 0], sizes = [4, 8, 128], strides = [1, 1, 1]} : vector<4x24x128xf32> to vector<4x8x128xf32>
    %63 = vector.shape_cast %62 : vector<4x8x128xf32> to vector<32x128xf32>
    %c0_54 = arith.constant 0 : index
    %c0_55 = arith.constant 0 : index
    %64 = vector.load %arg9[%c0_54, %c0_55] : memref<32x128xf32, #tpu.memory_space<vmem>>, vector<32x128xf32>
    %c3 = arith.constant 3 : index
    %c0_56 = arith.constant 0 : index
    %c0_57 = arith.constant 0 : index
    %65 = vector.load %arg5[%c3, %c0_56, %c0_57] : memref<9x128x128xf32, #tpu.memory_space<vmem>>, vector<1x128x128xf32>
    %66 = vector.shape_cast %65 : vector<1x128x128xf32> to vector<128x128xf32>
    %cst_58 = arith.constant dense<0.000000e+00> : vector<32x128xf32>
    %67 = tpu.matmul %63, %66, %cst_58 {dimension_numbers = #tpu.dot_dimension_numbers<[1], [0], [0], [1], [0, 0, 1, 1], [], []>} : vector<32x128xf32>, vector<128x128xf32>, vector<32x128xf32> -> vector<32x128xf32>
    %68 = arith.addf %64, %67 : vector<32x128xf32>
    %c0_59 = arith.constant 0 : index
    %c0_60 = arith.constant 0 : index
    %69 = vector.load %arg9[%c0_59, %c0_60] : memref<32x128xf32, #tpu.memory_space<vmem>>, vector<32x128xf32>
    tpu.vector_store %arg9[%c0_59, %c0_60], %68 {strides = array<i32>} : memref<32x128xf32, #tpu.memory_space<vmem>>, vector<32x128xf32>,
    %70 = vector.shape_cast %59 : vector<96x128xf32> to vector<4x24x128xf32>
    %71 = vector.extract_strided_slice %70 {offsets = [0, 8, 0], sizes = [4, 8, 128], strides = [1, 1, 1]} : vector<4x24x128xf32> to vector<4x8x128xf32>
    %72 = vector.shape_cast %71 : vector<4x8x128xf32> to vector<32x128xf32>
    %c0_61 = arith.constant 0 : index
    %c0_62 = arith.constant 0 : index
    %73 = vector.load %arg9[%c0_61, %c0_62] : memref<32x128xf32, #tpu.memory_space<vmem>>, vector<32x128xf32>
    %c4 = arith.constant 4 : index
    %c0_63 = arith.constant 0 : index
    %c0_64 = arith.constant 0 : index
    %74 = vector.load %arg5[%c4, %c0_63, %c0_64] : memref<9x128x128xf32, #tpu.memory_space<vmem>>, vector<1x128x128xf32>
    %75 = vector.shape_cast %74 : vector<1x128x128xf32> to vector<128x128xf32>
    %cst_65 = arith.constant dense<0.000000e+00> : vector<32x128xf32>
    %76 = tpu.matmul %72, %75, %cst_65 {dimension_numbers = #tpu.dot_dimension_numbers<[1], [0], [0], [1], [0, 0, 1, 1], [], []>} : vector<32x128xf32>, vector<128x128xf32>, vector<32x128xf32> -> vector<32x128xf32>
    %77 = arith.addf %73, %76 : vector<32x128xf32>
    %c0_66 = arith.constant 0 : index
    %c0_67 = arith.constant 0 : index
    %78 = vector.load %arg9[%c0_66, %c0_67] : memref<32x128xf32, #tpu.memory_space<vmem>>, vector<32x128xf32>
    tpu.vector_store %arg9[%c0_66, %c0_67], %77 {strides = array<i32>} : memref<32x128xf32, #tpu.memory_space<vmem>>, vector<32x128xf32>,
    %c95_i32_68 = arith.constant 95 : i32
    %79 = tpu.dynamic_rotate %59 by %c95_i32_68 dim 0 : vector<96x128xf32>, i32 -> vector<96x128xf32>
    %80 = vector.shape_cast %79 : vector<96x128xf32> to vector<4x24x128xf32>
    %81 = vector.extract_strided_slice %80 {offsets = [0, 8, 0], sizes = [4, 8, 128], strides = [1, 1, 1]} : vector<4x24x128xf32> to vector<4x8x128xf32>
    %82 = vector.shape_cast %81 : vector<4x8x128xf32> to vector<32x128xf32>
    %c0_69 = arith.constant 0 : index
    %c0_70 = arith.constant 0 : index
    %83 = vector.load %arg9[%c0_69, %c0_70] : memref<32x128xf32, #tpu.memory_space<vmem>>, vector<32x128xf32>
    %c5 = arith.constant 5 : index
    %c0_71 = arith.constant 0 : index
    %c0_72 = arith.constant 0 : index
    %84 = vector.load %arg5[%c5, %c0_71, %c0_72] : memref<9x128x128xf32, #tpu.memory_space<vmem>>, vector<1x128x128xf32>
    %85 = vector.shape_cast %84 : vector<1x128x128xf32> to vector<128x128xf32>
    %cst_73 = arith.constant dense<0.000000e+00> : vector<32x128xf32>
    %86 = tpu.matmul %82, %85, %cst_73 {dimension_numbers = #tpu.dot_dimension_numbers<[1], [0], [0], [1], [0, 0, 1, 1], [], []>} : vector<32x128xf32>, vector<128x128xf32>, vector<32x128xf32> -> vector<32x128xf32>
    %87 = arith.addf %83, %86 : vector<32x128xf32>
    %c0_74 = arith.constant 0 : index
    %c0_75 = arith.constant 0 : index
    %88 = vector.load %arg9[%c0_74, %c0_75] : memref<32x128xf32, #tpu.memory_space<vmem>>, vector<32x128xf32>
    tpu.vector_store %arg9[%c0_74, %c0_75], %87 {strides = array<i32>} : memref<32x128xf32, #tpu.memory_space<vmem>>, vector<32x128xf32>,
    %c2_76 = arith.constant 2 : index
    %c0_77 = arith.constant 0 : index
    %c0_78 = arith.constant 0 : index
    %89 = vector.load %arg8[%c2_76, %c0_77, %c0_78] : memref<6x24x128xf32, #tpu.memory_space<vmem>>, vector<4x24x128xf32>
    %90 = vector.shape_cast %89 : vector<4x24x128xf32> to vector<96x128xf32>
    %c1_i32_79 = arith.constant 1 : i32
    %91 = tpu.dynamic_rotate %90 by %c1_i32_79 dim 0 : vector<96x128xf32>, i32 -> vector<96x128xf32>
    %92 = vector.shape_cast %91 : vector<96x128xf32> to vector<4x24x128xf32>
    %93 = vector.extract_strided_slice %92 {offsets = [0, 8, 0], sizes = [4, 8, 128], strides = [1, 1, 1]} : vector<4x24x128xf32> to vector<4x8x128xf32>
    %94 = vector.shape_cast %93 : vector<4x8x128xf32> to vector<32x128xf32>
    %c0_80 = arith.constant 0 : index
    %c0_81 = arith.constant 0 : index
    %95 = vector.load %arg9[%c0_80, %c0_81] : memref<32x128xf32, #tpu.memory_space<vmem>>, vector<32x128xf32>
    %c6 = arith.constant 6 : index
    %c0_82 = arith.constant 0 : index
    %c0_83 = arith.constant 0 : index
    %96 = vector.load %arg5[%c6, %c0_82, %c0_83] : memref<9x128x128xf32, #tpu.memory_space<vmem>>, vector<1x128x128xf32>
    %97 = vector.shape_cast %96 : vector<1x128x128xf32> to vector<128x128xf32>
    %cst_84 = arith.constant dense<0.000000e+00> : vector<32x128xf32>
    %98 = tpu.matmul %94, %97, %cst_84 {dimension_numbers = #tpu.dot_dimension_numbers<[1], [0], [0], [1], [0, 0, 1, 1], [], []>} : vector<32x128xf32>, vector<128x128xf32>, vector<32x128xf32> -> vector<32x128xf32>
    %99 = arith.addf %95, %98 : vector<32x128xf32>
    %c0_85 = arith.constant 0 : index
    %c0_86 = arith.constant 0 : index
    %100 = vector.load %arg9[%c0_85, %c0_86] : memref<32x128xf32, #tpu.memory_space<vmem>>, vector<32x128xf32>
    tpu.vector_store %arg9[%c0_85, %c0_86], %99 {strides = array<i32>} : memref<32x128xf32, #tpu.memory_space<vmem>>, vector<32x128xf32>,
    %101 = vector.shape_cast %90 : vector<96x128xf32> to vector<4x24x128xf32>
    %102 = vector.extract_strided_slice %101 {offsets = [0, 8, 0], sizes = [4, 8, 128], strides = [1, 1, 1]} : vector<4x24x128xf32> to vector<4x8x128xf32>
    %103 = vector.shape_cast %102 : vector<4x8x128xf32> to vector<32x128xf32>
    %c0_87 = arith.constant 0 : index
    %c0_88 = arith.constant 0 : index
    %104 = vector.load %arg9[%c0_87, %c0_88] : memref<32x128xf32, #tpu.memory_space<vmem>>, vector<32x128xf32>
    %c7 = arith.constant 7 : index
    %c0_89 = arith.constant 0 : index
    %c0_90 = arith.constant 0 : index
    %105 = vector.load %arg5[%c7, %c0_89, %c0_90] : memref<9x128x128xf32, #tpu.memory_space<vmem>>, vector<1x128x128xf32>
    %106 = vector.shape_cast %105 : vector<1x128x128xf32> to vector<128x128xf32>
    %cst_91 = arith.constant dense<0.000000e+00> : vector<32x128xf32>
    %107 = tpu.matmul %103, %106, %cst_91 {dimension_numbers = #tpu.dot_dimension_numbers<[1], [0], [0], [1], [0, 0, 1, 1], [], []>} : vector<32x128xf32>, vector<128x128xf32>, vector<32x128xf32> -> vector<32x128xf32>
    %108 = arith.addf %104, %107 : vector<32x128xf32>
    %c0_92 = arith.constant 0 : index
    %c0_93 = arith.constant 0 : index
    %109 = vector.load %arg9[%c0_92, %c0_93] : memref<32x128xf32, #tpu.memory_space<vmem>>, vector<32x128xf32>
    tpu.vector_store %arg9[%c0_92, %c0_93], %108 {strides = array<i32>} : memref<32x128xf32, #tpu.memory_space<vmem>>, vector<32x128xf32>,
    %c95_i32_94 = arith.constant 95 : i32
    %110 = tpu.dynamic_rotate %90 by %c95_i32_94 dim 0 : vector<96x128xf32>, i32 -> vector<96x128xf32>
    %111 = vector.shape_cast %110 : vector<96x128xf32> to vector<4x24x128xf32>
    %112 = vector.extract_strided_slice %111 {offsets = [0, 8, 0], sizes = [4, 8, 128], strides = [1, 1, 1]} : vector<4x24x128xf32> to vector<4x8x128xf32>
    %113 = vector.shape_cast %112 : vector<4x8x128xf32> to vector<32x128xf32>
    %c0_95 = arith.constant 0 : index
    %c0_96 = arith.constant 0 : index
    %114 = vector.load %arg9[%c0_95, %c0_96] : memref<32x128xf32, #tpu.memory_space<vmem>>, vector<32x128xf32>
    %c8_97 = arith.constant 8 : index
    %c0_98 = arith.constant 0 : index
    %c0_99 = arith.constant 0 : index
    %115 = vector.load %arg5[%c8_97, %c0_98, %c0_99] : memref<9x128x128xf32, #tpu.memory_space<vmem>>, vector<1x128x128xf32>
    %116 = vector.shape_cast %115 : vector<1x128x128xf32> to vector<128x128xf32>
    %cst_100 = arith.constant dense<0.000000e+00> : vector<32x128xf32>
    %117 = tpu.matmul %113, %116, %cst_100 {dimension_numbers = #tpu.dot_dimension_numbers<[1], [0], [0], [1], [0, 0, 1, 1], [], []>} : vector<32x128xf32>, vector<128x128xf32>, vector<32x128xf32> -> vector<32x128xf32>
    %118 = arith.addf %114, %117 : vector<32x128xf32>
    %c0_101 = arith.constant 0 : index
    %c0_102 = arith.constant 0 : index
    %119 = vector.load %arg9[%c0_101, %c0_102] : memref<32x128xf32, #tpu.memory_space<vmem>>, vector<32x128xf32>
    tpu.vector_store %arg9[%c0_101, %c0_102], %118 {strides = array<i32>} : memref<32x128xf32, #tpu.memory_space<vmem>>, vector<32x128xf32>,
    %c0_103 = arith.constant 0 : index
    %c0_104 = arith.constant 0 : index
    %120 = vector.load %arg9[%c0_103, %c0_104] : memref<32x128xf32, #tpu.memory_space<vmem>>, vector<32x128xf32>
    %cst_105 = arith.constant 0.000000e+00 : f32
    %121 = vector.broadcast %cst_105 : f32 to vector<32x128xf32>
    %122 = arith.maximumf %120, %121 : vector<32x128xf32>
    %123 = vector.extract_strided_slice %122 {offsets = [0, 0], sizes = [32, 8], strides = [1, 1]} : vector<32x128xf32> to vector<32x8xf32>
    %124 = vector.shape_cast %123 : vector<32x8xf32> to vector<4x8x8xf32>
    %c0_106 = arith.constant 0 : index
    %c0_107 = arith.constant 0 : index
    %c0_108 = arith.constant 0 : index
    %c0_109 = arith.constant 0 : index
    %125 = vector.load %arg7[%c0_106, %c0_107, %c0_108, %c0_109] : memref<1x4x8x8xf32, #tpu.memory_space<vmem>>, vector<1x4x8x8xf32>
    %126 = vector.shape_cast %125 : vector<1x4x8x8xf32> to vector<4x8x8xf32>
    %127 = vector.shape_cast %124 : vector<4x8x8xf32> to vector<1x4x8x8xf32>
    tpu.vector_store %arg7[%c0_106, %c0_107, %c0_108, %c0_109], %127 {strides = array<i32>} : memref<1x4x8x8xf32, #tpu.memory_space<vmem>>, vector<1x4x8x8xf32>,
    return
  }
  func.func @transform_0(%arg0: i32, %arg1: i32) -> (i32, i32, i32, i32, i32) {
    %c0_i32 = arith.constant 0 : i32
    %c0_i32_0 = arith.constant 0 : i32
    %c0_i32_1 = arith.constant 0 : i32
    %c0_i32_2 = arith.constant 0 : i32
    return %arg0, %arg1, %c0_i32, %c0_i32_0, %c0_i32_1 : i32, i32, i32, i32, i32
  }
  func.func @transform_1(%arg0: i32, %arg1: i32) -> (i32, i32) {
    %c0_i32 = arith.constant 0 : i32
    %c0_i32_0 = arith.constant 0 : i32
    %c0_i32_1 = arith.constant 0 : i32
    return %c0_i32, %c0_i32_0 : i32, i32
  }
  func.func @transform_2(%arg0: i32, %arg1: i32) -> (i32, i32) {
    %c0_i32 = arith.constant 0 : i32
    %c0_i32_0 = arith.constant 0 : i32
    %c0_i32_1 = arith.constant 0 : i32
    return %c0_i32, %c0_i32_0 : i32, i32
  }
  func.func @transform_3(%arg0: i32, %arg1: i32) -> (i32, i32, i32) {
    %c0_i32 = arith.constant 0 : i32
    %c0_i32_0 = arith.constant 0 : i32
    %c0_i32_1 = arith.constant 0 : i32
    %c0_i32_2 = arith.constant 0 : i32
    return %c0_i32, %c0_i32_0, %c0_i32_1 : i32, i32, i32
  }
  func.func @transform_4(%arg0: i32, %arg1: i32) -> (i32, i32) {
    %c0_i32 = arith.constant 0 : i32
    %c0_i32_0 = arith.constant 0 : i32
    %c0_i32_1 = arith.constant 0 : i32
    return %c0_i32, %c0_i32_0 : i32, i32
  }
  func.func @transform_5(%arg0: i32, %arg1: i32) -> (i32, i32, i32, i32) {
    %c0_i32 = arith.constant 0 : i32
    %c0_i32_0 = arith.constant 0 : i32
    %c0_i32_1 = arith.constant 0 : i32
    return %arg0, %arg1, %c0_i32, %c0_i32_0 : i32, i32, i32, i32
  }
}

</mosaic_0001>

<bundles_post_ra>
// kernel: resblock_down.1
= control target key start
LH: loop header
LB: loop body
LE: loop exit
PB: predicated region body
PF: predicated region fallthrough
CT: control target
= control target key end

     0   :  { %s2796_s18 = smov 0   ;;  %s2798_s19 = smov 0   ;;  %s3441_s0 = inlined_call_operand.vmem [shape: f32[2,2,6,8,36], index: 0, kind: input, shape index: {}]   ;;  %s3442_s1 = inlined_call_operand.vmem [shape: f32[36,256], index: 1, kind: input, shape index: {}]   ;;  %s3443_s2 = inlined_call_operand.vmem [shape: f32[1,256], index: 2, kind: input, shape index: {}]   ;;  %s3444_s3 = inlined_call_operand.vmem [shape: f32[9,128,128], index: 3, kind: input, shape index: {}]   ;;  %s3445_s4 = inlined_call_operand.vmem [shape: f32[1,128], index: 4, kind: input, shape index: {}]   ;;  %s3446_s5 = inlined_call_operand.vmem [shape: f32[2,8,8,8], index: 5, kind: output, shape index: {}]  }
   0x1   :  { %s2800_s20 = smov 0   ;;  %s2802_s21 = smov 0  }
   0x2   :  { %s2804_s22 = smov 0  }
   0x3 LB: > { %s24_s23 = sadd.s32 1, %s2753_s20  ;;  %s27_s24 = sadd.s32 1, %s2757_s21  ;;  %s2761_s22 = sphi %s2804_s22, %s15_s22   ;;  %s2757_s21 = sphi %s2802_s21, %s3450_s21   ;;  %s2753_s20 = sphi %s2800_s20, %s3449_s20   ;;  %s2749_s19 = sphi %s2798_s19, %s3448_s19   ;;  %s2745_s18 = sphi %s2796_s18, %s3447_s18  }
   0x4   : > { %p25_p0 = scmp.ge.s32.totalorder %s24_s23, 2  ;;  %p1714_p1 = scmp.ge.s32.totalorder %s2761_s22, 1 }
   0x5   : > { %p207_p2 = scmp.lt.s32.totalorder %s2761_s22, 5 }
   0x6   : > { %s3452_s23 = smov (%p25_p0, %s24_s23), 0  ;;  %s3454_s24 = smov (!%p25_p0, %s27_s24), %s2757_s21 }
   0x7   : > { %p208_p3 = pnand %p1714_p1, %p207_p2  ;;  %p29_p4 = scmp.ge.s32.totalorder %s3454_s24, 2 }
   0x8   : > { %v269_v0 = vld [vmem:[%s3442_s1 + $0x8] sm:$0xff] (!%p208_p3)  ;;  %v271_v1 = vld [vmem:[%s3442_s1 + $0x18] sm:$0xff] (!%p208_p3)  ;;  %v268_v2 = vld [vmem:[%s3442_s1] sm:$0xff] (!%p208_p3)  ;;  %p243_p5 = scmp.lt.s32.totalorder (!%p208_p3), %s2749_s19, 1  ;;  %v2763_v7 = vmov (!%p208_p3), 0.0   ;;  %p245_p6 = scmp.lt.s32.totalorder (!%p208_p3), %s2745_s18, 1  ;;  %v280_v21 = vlaneseq (!%p208_p3) }
   0x9   : > { %s3456_s24 = smov (%p29_p4, %s3454_s24), 0  ;;  %211 = sbr.rel (%p208_p3) target bundleno = 656 (0x290), region = 40 }
   0xa   : > { %v2382_v3 = vpack.c.bf16 (!%p208_p3), %v271_v1, %v269_v0  ;;  %v270_v4 = vld [vmem:[%s3442_s1 + $0x10] sm:$0xff] (!%p208_p3)  ;;  %v273_v5 = vld [vmem:[%s3442_s1 + $0x28] sm:$0xff] (!%p208_p3)  ;;  %v275_v6 = vld [vmem:[%s3442_s1 + $0x38] sm:$0xff] (!%p208_p3)  ;;  %380 = vmatprep.mubr.f32.mxu0 (!%p208_p3), %v2763_v7  ;;  %421 = vst [vmem:[#allocation2] sm:$0xff] (!%p208_p3), %v2763_v7  ;;  %s1716_s12 = sshll.u32 (!%p208_p3), %s2745_s18, 2  ;;  %vm309_vm0 = vcmask (!%p208_p3), 1043456  }
   0xb   : > { %422 = vst [vmem:[#allocation2 + $0x18] sm:$0xff] (!%p208_p3), %v2763_v7  ;;  %423 = vst [vmem:[#allocation2 + $0x30] sm:$0xff] (!%p208_p3), %v2763_v7  ;;  %v2384_v8 = vpack.c.bf16 (!%p208_p3), %v270_v4, %v268_v2  ;;  %v2386_v9 = vpack.c.bf16 (!%p208_p3), %v275_v6, %v273_v5  ;;  %v272_v10 = vld [vmem:[%s3442_s1 + $0x20] sm:$0xff] (!%p208_p3)  ;;  %v274_v11 = vld [vmem:[%s3442_s1 + $0x30] sm:$0xff] (!%p208_p3)  ;;  %p255_p7 = scmp.lt.s32.totalorder (!%p208_p3), %s1716_s12, 7  ;;  %vm290_vm1 = vcmask (!%p208_p3), 293888  }
   0xc   : > { %424 = vst [vmem:[#allocation2 + $0x48] sm:$0xff] (!%p208_p3), %v2763_v7  ;;  %425 = vst [vmem:[#allocation2 + $0x60] sm:$0xff] (!%p208_p3), %v2763_v7  ;;  %2383 = vmatprep.subr.bf16.mxu0 (!%p208_p3), %v2382_v3  ;;  %v2388_v12 = vpack.c.bf16 (!%p208_p3), %v274_v11, %v272_v10  ;;  %v277_v13 = vld [vmem:[%s3442_s1 + $0x48] sm:$0xf] (!%p208_p3)  ;;  %v276_v14 = vld [vmem:[%s3442_s1 + $0x40] sm:$0xf] (!%p208_p3) }
   0xd   : > { %426 = vst [vmem:[#allocation2 + $0x78] sm:$0xff] (!%p208_p3), %v2763_v7  ;;  %427 = vst [vmem:[#allocation2 + $0x10] sm:$0xff] (!%p208_p3), %v2763_v7  ;;  %2385 = vmatpush1.bf16.msra.mxu0 (!%p208_p3), %v2384_v8  ;;  %v2881_v22 = vshrl.u32 (!%p208_p3), %v280_v21, 7  ;;  %v278_v24 = vld [vmem:[%s3443_s2] sm:$0x3] (!%p208_p3)  ;;  %p1727_p8 = scmp.ne.s32.totalorder (!%p208_p3), %s2745_s18, 0 }
   0xe   : > { %428 = vst [vmem:[#allocation2 + $0x28] sm:$0xff] (!%p208_p3), %v2763_v7  ;;  %429 = vst [vmem:[#allocation2 + $0x40] sm:$0xff] (!%p208_p3), %v2763_v7  ;;  %2387 = vmatprep.subr.bf16.mxu0 (!%p208_p3), %v2386_v9 }
   0xf   : > { %430 = vst [vmem:[#allocation2 + $0x58] sm:$0xff] (!%p208_p3), %v2763_v7  ;;  %431 = vst [vmem:[#allocation2 + $0x70] sm:$0xff] (!%p208_p3), %v2763_v7  ;;  %v282_v23 = vsub.s32 (!%p208_p3), 0, %v2881_v22  ;;  %v286_v26 = vsub.s32 (!%p208_p3), 1, %v2881_v22 }
  0x10   : > { %432 = vst [vmem:[#allocation2 + $0x88] sm:$0xff] %v2763_v7  ;;  %s3458_s19 = smov (!%p243_p5, %s2749_s19), 1  ;;  %s3460_s12 = smov (!%p255_p7, %s1716_s12), 7 }
  0x11   : > { %s246_s17 = scalar_select %p245_p6, %s2745_s18, 1  ;;  %2389 = vmatpush1.bf16.msra.mxu0 %v2388_v12  ;;  %v283_v25 = vrot.slane %v278_v24, %v282_v23  ;;  %v287_v30 = vrot.slane %v278_v24, %v286_v26 }
  0x12   : > { %s2679_s25 = smul.u32 12, %s3458_s19  ;;  %s1717_s27 = sshll.u32 %s3458_s19, 3  ;;  %1719 = vmatprep.subr.msk.mxu0 %vm309_vm0, %v277_v13  ;;  %v2764_v56 = vmov (!%p1727_p8), 0.0  }
  0x13   : > { %s2678_s26 = smul.u32 6, %s246_s17  ;;  %s258_s7 = sadd.s32 %s1717_s27, %s3460_s12 }
  0x14   : > { %s1718_s19 = sshll.u32 %s258_s7, 3 }
  0x15   : > { %s249_s30 = sadd.s32 %s2679_s25, %s2678_s26  ;;  %s2873_s16 = scalar_lea.vmem %s3446_s5, %s1718_s19  ;;  %1720 = vmatpush1.msk.msra.mxu0 %vm309_vm0, %v276_v14 }
  0x16   : > { %s1715_s6 = sshll.u32 %s249_s30, 3 }
  0x17   : > { %s251_s13 = scalar_lea.vmem %s3441_s0, %s1715_s6 }
  0x18   : > { %v262_v15 = vld [vmem:[%s251_s13] sm:$0xff]  ;;  %v263_v16 = vld [vmem:[%s251_s13 + $0x8] sm:$0xff]  ;;  %v264_v17 = vld [vmem:[%s251_s13 + $0x10] sm:$0xff] }
  0x19   : > { %1721 = vmatmul.mubr.msk.f32.vlgmr.msra.gmra.mrb[0].mxu0 %vm290_vm1, %v262_v15  ;;  %v265_v18 = vld [vmem:[%s251_s13 + $0x18] sm:$0xff]  ;;  %v266_v19 = vld [vmem:[%s251_s13 + $0x20] sm:$0xff]  ;;  %v267_v20 = vld [vmem:[%s251_s13 + $0x28] sm:$0xff] }
  0x1a   : > { %385 = vmatprep.mubr.f32.mxu0 %v2763_v7 }
  0x1d   : > { %1722 = vmatmul.mubr.msk.f32.gmra.mrb[2].mxu0 %vm290_vm1, %v263_v16 }
  0x1e   : > { %391 = vmatprep.mubr.f32.mxu0 %v2763_v7 }
  0x21   : > { %1723 = vmatmul.mubr.msk.f32.gmra.mrb[4].mxu0 %vm290_vm1, %v264_v17 }
  0x22   : > { %397 = vmatprep.mubr.f32.mxu0 %v2763_v7 }
  0x25   : > { %1724 = vmatmul.mubr.msk.f32.gmra.mrb[6].mxu0 %vm290_vm1, %v265_v18 }
  0x26   : > { %403 = vmatprep.mubr.f32.mxu0 %v2763_v7 }
  0x29   : > { %1725 = vmatmul.mubr.msk.f32.gmra.mrb[8].mxu0 %vm290_vm1, %v266_v19 }
  0x2a   : > { %409 = vmatprep.mubr.f32.mxu0 %v2763_v7 }
  0x2d   : > { %1726 = vmatmul.mubr.msk.f32.gmra.mrb[10].mxu0 %vm290_vm1, %v267_v20 }
  0xec   : > { %v382_v27 = vpop.f32.mrb[0].mxu0 }
  0xed   : > { %v383_v28 = vadd.f32 %v382_v27, %v283_v25  ;;  %v384_v29 = vpop.f32.mrb[1].mxu0 }
  0xef   : > { %v415_v31 = vmax.f32 %v383_v28, 0.0 }
  0xf0   : > { %v387_v32 = vpop.f32.mrb[2].mxu0 }
  0xf1   : > { %433 = vst [vmem:[#allocation2 + $0x8] sm:$0xff] %v415_v31  ;;  %v388_v33 = vadd.f32 %v387_v32, %v283_v25  ;;  %v389_v34 = vpop.f32.mrb[3].mxu0 }
  0xf2   : > { %v2888_v35 = vadd.f32 %v389_v34, %v287_v30  ;;  %443 = vst [vmem:[#allocation2 + $0x8] sm:$0xff] (!%p1727_p8), %v2764_v56 }
  0xf3   : > { %v416_v36 = vmax.f32 %v388_v33, 0.0 }
  0xf4   : > { %v393_v37 = vpop.f32.mrb[4].mxu0 }
  0xf5   : > { %434 = vst [vmem:[#allocation2 + $0x20] sm:$0xff] %v416_v36  ;;  %v394_v38 = vadd.f32 %v393_v37, %v283_v25  ;;  %v395_v39 = vpop.f32.mrb[5].mxu0 }
  0xf6   : > { %v2890_v40 = vadd.f32 %v395_v39, %v287_v30 }
  0xf7   : > { %v417_v41 = vmax.f32 %v394_v38, 0.0 }
  0xf8   : > { %v399_v42 = vpop.f32.mrb[6].mxu0 }
  0xf9   : > { %435 = vst [vmem:[#allocation2 + $0x38] sm:$0xff] %v417_v41  ;;  %v400_v43 = vadd.f32 %v399_v42, %v283_v25  ;;  %v401_v44 = vpop.f32.mrb[7].mxu0 }
  0xfa   : > { %v2892_v45 = vadd.f32 %v401_v44, %v287_v30 }
  0xfb   : > { %v418_v46 = vmax.f32 %v400_v43, 0.0 }
  0xfc   : > { %v405_v47 = vpop.f32.mrb[8].mxu0 }
  0xfd   : > { %436 = vst [vmem:[#allocation2 + $0x50] sm:$0xff] %v418_v46  ;;  %v406_v48 = vadd.f32 %v405_v47, %v283_v25  ;;  %v407_v49 = vpop.f32.mrb[9].mxu0 }
  0xfe   : > { %v2894_v50 = vadd.f32 %v407_v49, %v287_v30 }
  0xff   : > { %v419_v51 = vmax.f32 %v406_v48, 0.0  ;;  %442 = sbr.rel (%p1727_p8) target bundleno = 262 (0x106), region = 44 }
 0x100   : > { %v411_v52 = vpop.f32.mrb[10].mxu0 }
 0x101   : > { %437 = vst [vmem:[#allocation2 + $0x68] sm:$0xff] %v419_v51  ;;  %v412_v53 = vadd.f32 %v411_v52, %v283_v25  ;;  %v413_v54 = vpop.f32.mrb[11].mxu0 }
 0x103   : > { %v420_v55 = vmax.f32 %v412_v53, 0.0 }
 0x105   : > { %438 = vst [vmem:[#allocation2 + $0x80] sm:$0xff] %v420_v55 }
 0x106 PF: > { %p1728_p9 = scmp.ne.s32.totalorder %s2745_s18, 1 }
 0x107   : > { %v2765_v57 = vmov (!%p1728_p9), 0.0  }
 0x108   : > { %447 = sbr.rel (%p1728_p9) target bundleno = 271 (0x10f), region = 48  ;;  %449 = vst [vmem:[#allocation2 + $0x80] sm:$0xff] (!%p1728_p9), %v2765_v57 }
 0x10f PF: > { %v496_v58 = vld [vmem:[%s3444_s3] sm:$0xff]  ;;  %v497_v59 = vld [vmem:[%s3444_s3 + $0x8] sm:$0xff]  ;;  %v498_v63 = vld [vmem:[%s3444_s3 + $0x10] sm:$0xff]  ;;  %vm487_vm2 = vcmp.lt.s32.totalorder %v2881_v22, 1  ;;  %vm727_vm3 = vcmp.lt.s32.totalorder %v2881_v22, 7  ;;  %vm1612_vm4 = vcmask 64512  }
 0x110   : > { %v1730_v60 = vld [vmem:[%s3444_s3 + $0x80] sm:$0xff]  ;;  %v2390_v61 = vpack.c.bf16 %v497_v59, %v496_v58  ;;  %v1731_v62 = vld [vmem:[%s3444_s3 + $0x88] sm:$0xff]  ;;  %v499_v0 = vld [vmem:[%s3444_s3 + $0x18] sm:$0xff] }
 0x111   : > { %v2422_v1 = vpack.c.bf16 %v1731_v62, %v1730_v60  ;;  %v2394_v2 = vpack.c.bf16 %v499_v0, %v498_v63  ;;  %v1732_v3 = vld [vmem:[%s3444_s3 + $0x90] sm:$0xff]  ;;  %v1733_v4 = vld [vmem:[%s3444_s3 + $0x98] sm:$0xff]  ;;  %v500_v5 = vld [vmem:[%s3444_s3 + $0x20] sm:$0xff] }
 0x112   : > { %2391 = vmatprep.subr.bf16.mxu1 %v2390_v61  ;;  %v2426_v6 = vpack.c.bf16 %v1733_v4, %v1732_v3  ;;  %v501_v7 = vld [vmem:[%s3444_s3 + $0x28] sm:$0xff]  ;;  %v1734_v8 = vld [vmem:[%s3444_s3 + $0xa0] sm:$0xff]  ;;  %v502_v12 = vld [vmem:[%s3444_s3 + $0x30] sm:$0xff] }
 0x113   : > { %v1735_v9 = vld [vmem:[%s3444_s3 + $0xa8] sm:$0xff]  ;;  %2393 = vmatpush3.bf16.msra.mxu1 %v2390_v61  ;;  %2423 = vmatprep.subr.bf16.mxu0 %v2422_v1  ;;  %v2398_v10 = vpack.c.bf16 %v501_v7, %v500_v5  ;;  %v503_v13 = vld [vmem:[%s3444_s3 + $0x38] sm:$0xff]  ;;  %v1736_v14 = vld [vmem:[%s3444_s3 + $0xb0] sm:$0xff] }
 0x114   : > { %2425 = vmatpush3.bf16.msra.mxu0 %v2422_v1  ;;  %2395 = vmatprep.subr.bf16.mxu1 %v2394_v2  ;;  %v2430_v11 = vpack.c.bf16 %v1735_v9, %v1734_v8  ;;  %v1737_v15 = vld [vmem:[%s3444_s3 + $0xb8] sm:$0xff]  ;;  %v2402_v16 = vpack.c.bf16 %v503_v13, %v502_v12  ;;  %v504_v18 = vld [vmem:[%s3444_s3 + $0x40] sm:$0xff]  ;;  %v505_v19 = vld [vmem:[%s3444_s3 + $0x48] sm:$0xff] }
 0x115   : > { %2427 = vmatprep.subr.bf16.mxu0 %v2426_v6  ;;  %v2434_v17 = vpack.c.bf16 %v1737_v15, %v1736_v14  ;;  %v465_v20 = vld [vmem:[#allocation2] sm:$0xff]  ;;  %v1739_v23 = vld [vmem:[%s3444_s3 + $0xc8] sm:$0xff]  ;;  %v2406_v27 = vpack.c.bf16 %v505_v19, %v504_v18  ;;  %v506_v29 = vld [vmem:[%s3444_s3 + $0x50] sm:$0xff] }
 0x116   : > { %v1738_v21 = vld [vmem:[%s3444_s3 + $0xc0] sm:$0xff]  ;;  %v2958_v24 = vld [vmem:[#allocation2 + $0x8] sm:$0xff]  ;;  %v477_v25 = vrot.slane %v465_v20, 7  ;;  %v507_v30 = vld [vmem:[%s3444_s3 + $0x58] sm:$0xff] }
 0x117   : > { %2397 = vmatpush3.bf16.msra.mxu1 %v2394_v2  ;;  %v478_v26 = vrot.slane %v2958_v24, 7  ;;  %2110 = vmatprep.mubr.f32.mxu0 %v2958_v24  ;;  %v2438_v28 = vpack.c.bf16 %v1739_v23, %v1738_v21  ;;  %v1740_v32 = vld [vmem:[%s3444_s3 + $0xd0] sm:$0xff]  ;;  %v1741_v33 = vld [vmem:[%s3444_s3 + $0xd8] sm:$0xff]  ;;  %v2410_v34 = vpack.c.bf16 %v507_v30, %v506_v29  ;;  %v508_v37 = vld [vmem:[%s3444_s3 + $0x60] sm:$0xff]  ;;  %v719_v19 = vrot.slane %v2958_v24, 1 }
 0x118   : > { %2429 = vmatpush3.bf16.msra.mxu0 %v2426_v6  ;;  %2399 = vmatprep.subr.bf16.mxu1 %v2398_v10  ;;  %v2442_v36 = vpack.c.bf16 %v1741_v33, %v1740_v32  ;;  %v509_v38 = vld [vmem:[%s3444_s3 + $0x68] sm:$0xff]  ;;  %v1742_v39 = vld [vmem:[%s3444_s3 + $0xe0] sm:$0xff]  ;;  %v510_v44 = vld [vmem:[%s3444_s3 + $0x70] sm:$0xff] }
 0x119   : > { %2431 = vmatprep.subr.bf16.mxu0 %v2430_v11  ;;  %v491_v31 = vsel %vm487_vm2, %v477_v25, %v478_v26  ;;  %v1743_v41 = vld [vmem:[%s3444_s3 + $0xe8] sm:$0xff]  ;;  %v2414_v42 = vpack.c.bf16 %v509_v38, %v508_v37  ;;  %v511_v46 = vld [vmem:[%s3444_s3 + $0x78] sm:$0xff]  ;;  %v1744_v47 = vld [vmem:[%s3444_s3 + $0xf0] sm:$0xff] }
 0x11a   : > { %2072 = vmatprep.mubr.f32.mxu1 %v491_v31  ;;  %v2446_v43 = vpack.c.bf16 %v1743_v41, %v1742_v39  ;;  %v1745_v48 = vld [vmem:[%s3444_s3 + $0xf8] sm:$0xff]  ;;  %v2418_v49 = vpack.c.bf16 %v511_v46, %v510_v44  ;;  %v3001_v52 = vld [vmem:[#allocation2 + $0x20] sm:$0xff]  ;;  %v1747_v55 = vld [vmem:[%s3444_s3 + $0x108] sm:$0xff] }
 0x11b   : > { %2401 = vmatpush3.bf16.msra.mxu1 %v2398_v10  ;;  %v468_v51 = vld [vmem:[#allocation2 + $0x18] sm:$0xff]  ;;  %v2450_v53 = vpack.c.bf16 %v1745_v48, %v1744_v47  ;;  %v1746_v54 = vld [vmem:[%s3444_s3 + $0x100] sm:$0xff]  ;;  %v1763_v57 = vld [vmem:[%s3444_s3 + $0x188] sm:$0xff]  ;;  %v480_v59 = vrot.slane %v3001_v52, 7 }
 0x11c   : > { %2433 = vmatpush3.bf16.msra.mxu0 %v2430_v11  ;;  %2403 = vmatprep.subr.bf16.mxu1 %v2402_v16  ;;  %v1762_v56 = vld [vmem:[%s3444_s3 + $0x180] sm:$0xff]  ;;  %v479_v58 = vrot.slane %v468_v51, 7  ;;  %v471_v60 = vld [vmem:[#allocation2 + $0x30] sm:$0xff]  ;;  %v3016_v61 = vld [vmem:[#allocation2 + $0x38] sm:$0xff]  ;;  %v2454_v62 = vpack.c.bf16 %v1747_v55, %v1746_v54 }
 0x11d   : > { %2435 = vmatprep.subr.bf16.mxu0 %v2434_v17  ;;  %v474_v63 = vld [vmem:[#allocation2 + $0x48] sm:$0xff]  ;;  %v3018_v0 = vld [vmem:[#allocation2 + $0x50] sm:$0xff]  ;;  %v2486_v1 = vpack.c.bf16 %v1763_v57, %v1762_v56  ;;  %v1749_v3 = vld [vmem:[%s3444_s3 + $0x118] sm:$0xff]  ;;  %v481_v6 = vrot.slane %v471_v60, 7  ;;  %v482_v7 = vrot.slane %v3016_v61, 7 }
 0x11e   : > { %v1748_v2 = vld [vmem:[%s3444_s3 + $0x110] sm:$0xff]  ;;  %v1765_v5 = vld [vmem:[%s3444_s3 + $0x198] sm:$0xff]  ;;  %v490_v8 = vsel %vm487_vm2, %v479_v58, %v480_v59  ;;  %v483_v9 = vrot.slane %v474_v63, 7  ;;  %v484_v10 = vrot.slane %v3018_v0, 7  ;;  %v1750_v14 = vld [vmem:[%s3444_s3 + $0x120] sm:$0xff] }
 0x11f   : > { %2405 = vmatpush3.bf16.msra.mxu1 %v2402_v16  ;;  %v1764_v4 = vld [vmem:[%s3444_s3 + $0x190] sm:$0xff]  ;;  %v2458_v12 = vpack.c.bf16 %v1749_v3, %v1748_v2  ;;  %v1751_v15 = vld [vmem:[%s3444_s3 + $0x128] sm:$0xff]  ;;  %v1766_v16 = vld [vmem:[%s3444_s3 + $0x1a0] sm:$0xff]  ;;  %v3050_v18 = vsel %vm487_vm2, %v481_v6, %v482_v7 }
 0x120   : > { %2437 = vmatpush3.bf16.msra.mxu0 %v2434_v17  ;;  %2407 = vmatprep.subr.bf16.mxu1 %v2406_v27  ;;  %v467_v11 = vld [vmem:[#allocation2 + $0x10] sm:$0xff]  ;;  %v2490_v13 = vpack.c.bf16 %v1765_v5, %v1764_v4  ;;  %v1767_v17 = vld [vmem:[%s3444_s3 + $0x1a8] sm:$0xff]  ;;  %v3056_v21 = vsel %vm487_vm2, %v483_v9, %v484_v10  ;;  %v2462_v23 = vpack.c.bf16 %v1751_v15, %v1750_v14  ;;  %v1753_v24 = vld [vmem:[%s3444_s3 + $0x138] sm:$0xff]  ;;  %v721_v5 = vrot.slane %v3001_v52, 1 }
 0x121   : > { %2439 = vmatprep.subr.bf16.mxu0 %v2438_v28  ;;  %v720_v20 = vrot.slane %v467_v11, 1  ;;  %v2494_v25 = vpack.c.bf16 %v1767_v17, %v1766_v16  ;;  %v1752_v26 = vld [vmem:[%s3444_s3 + $0x130] sm:$0xff]  ;;  %v1754_v32 = vld [vmem:[%s3444_s3 + $0x140] sm:$0xff]  ;;  %v1755_v33 = vld [vmem:[%s3444_s3 + $0x148] sm:$0xff]  ;;  %v723_v10 = vrot.slane %v3016_v61, 1  ;;  %v725_v17 = vrot.slane %v3018_v0, 1 }
 0x122   : > { %v2466_v30 = vpack.c.bf16 %v1753_v24, %v1752_v26  ;;  %v2470_v37 = vpack.c.bf16 %v1755_v33, %v1754_v32  ;;  %v1756_v39 = vld [vmem:[%s3444_s3 + $0x150] sm:$0xff]  ;;  %v1757_v41 = vld [vmem:[%s3444_s3 + $0x158] sm:$0xff]  ;;  %v1758_v47 = vld [vmem:[%s3444_s3 + $0x160] sm:$0xff] }
 0x123   : > { %2409 = vmatpush3.bf16.msra.mxu1 %v2406_v27  ;;  %v1768_v27 = vld [vmem:[%s3444_s3 + $0x1b0] sm:$0xff]  ;;  %v731_v29 = vsel %vm727_vm3, %v719_v19, %v720_v20  ;;  %v2474_v44 = vpack.c.bf16 %v1757_v41, %v1756_v39  ;;  %v1759_v48 = vld [vmem:[%s3444_s3 + $0x168] sm:$0xff]  ;;  %v1761_v56 = vld [vmem:[%s3444_s3 + $0x178] sm:$0xff] }
 0x124   : > { %2441 = vmatpush3.bf16.msra.mxu0 %v2438_v28  ;;  %2411 = vmatprep.subr.bf16.mxu1 %v2410_v34  ;;  %v1769_v28 = vld [vmem:[%s3444_s3 + $0x1b8] sm:$0xff]  ;;  %v1775_v51 = vld [vmem:[%s3444_s3 + $0x1e8] sm:$0xff]  ;;  %v1760_v55 = vld [vmem:[%s3444_s3 + $0x170] sm:$0xff] }
 0x125   : > { %2443 = vmatprep.subr.bf16.mxu0 %v2442_v36  ;;  %v2498_v31 = vpack.c.bf16 %v1769_v28, %v1768_v27  ;;  %v1776_v57 = vld [vmem:[%s3444_s3 + $0x1f0] sm:$0xff]  ;;  %v1777_v58 = vld [vmem:[%s3444_s3 + $0x1f8] sm:$0xff]  ;;  %v2482_v59 = vpack.c.bf16 %v1761_v56, %v1760_v55  ;;  %v470_v60 = vld [vmem:[#allocation2 + $0x28] sm:$0xff] }
 0x126   : > { %v1778_v63 = vld [vmem:[%s3444_s3 + $0x200] sm:$0xff]  ;;  %v1795_v3 = vld [vmem:[%s3444_s3 + $0x288] sm:$0xff]  ;;  %v722_v6 = vrot.slane %v470_v60, 1  ;;  %v1780_v14 = vld [vmem:[%s3444_s3 + $0x210] sm:$0xff] }
 0x127   : > { %2413 = vmatpush3.bf16.msra.mxu1 %v2410_v34  ;;  %v1770_v34 = vld [vmem:[%s3444_s3 + $0x1c0] sm:$0xff]  ;;  %v1781_v15 = vld [vmem:[%s3444_s3 + $0x218] sm:$0xff]  ;;  %v1796_v20 = vld [vmem:[%s3444_s3 + $0x290] sm:$0xff] }
 0x128   : > { %2445 = vmatpush3.bf16.msra.mxu0 %v2442_v36  ;;  %2415 = vmatprep.subr.bf16.mxu1 %v2414_v42  ;;  %v1771_v36 = vld [vmem:[%s3444_s3 + $0x1c8] sm:$0xff]  ;;  %v1794_v2 = vld [vmem:[%s3444_s3 + $0x280] sm:$0xff]  ;;  %v730_v16 = vsel %vm727_vm3, %v721_v5, %v722_v6  ;;  %v2522_v27 = vpack.c.bf16 %v1781_v15, %v1780_v14  ;;  %v1785_v39 = vld [vmem:[%s3444_s3 + $0x238] sm:$0xff] }
 0x129   : > { %2447 = vmatprep.subr.bf16.mxu0 %v2446_v43  ;;  %v2502_v38 = vpack.c.bf16 %v1771_v36, %v1770_v34  ;;  %v473_v4 = vld [vmem:[#allocation2 + $0x40] sm:$0xff]  ;;  %v2550_v9 = vpack.c.bf16 %v1795_v3, %v1794_v2  ;;  %v1799_v32 = vld [vmem:[%s3444_s3 + $0x2a8] sm:$0xff]  ;;  %v1800_v41 = vld [vmem:[%s3444_s3 + $0x2b0] sm:$0xff] }
 0x12a   : > { %v724_v11 = vrot.slane %v473_v4, 1  ;;  %v1782_v28 = vld [vmem:[%s3444_s3 + $0x220] sm:$0xff]  ;;  %v1804_v55 = vld [vmem:[%s3444_s3 + $0x2d0] sm:$0xff]  ;;  %v1805_v56 = vld [vmem:[%s3444_s3 + $0x2d8] sm:$0xff] }
 0x12b   : > { %2417 = vmatpush3.bf16.msra.mxu1 %v2414_v42  ;;  %v1772_v42 = vld [vmem:[%s3444_s3 + $0x1d0] sm:$0xff]  ;;  %v1791_v60 = vld [vmem:[%s3444_s3 + $0x268] sm:$0xff]  ;;  %v1793_v4 = vld [vmem:[%s3444_s3 + $0x278] sm:$0xff] }
 0x12c   : > { %2449 = vmatpush3.bf16.msra.mxu0 %v2446_v43  ;;  %2419 = vmatprep.subr.bf16.mxu1 %v2418_v49  ;;  %v1773_v43 = vld [vmem:[%s3444_s3 + $0x1d8] sm:$0xff]  ;;  %v3159_v24 = vsel %vm727_vm3, %v723_v10, %v724_v11  ;;  %v1792_v3 = vld [vmem:[%s3444_s3 + $0x270] sm:$0xff]  ;;  %v1811_v10 = vld [vmem:[%s3444_s3 + $0x308] sm:$0xff] }
 0x12d   : > { %2451 = vmatprep.subr.bf16.mxu0 %v2450_v53  ;;  %v2506_v46 = vpack.c.bf16 %v1773_v43, %v1772_v42  ;;  %v1801_v42 = vld [vmem:[%s3444_s3 + $0x2b8] sm:$0xff]  ;;  %v1808_v5 = vld [vmem:[%s3444_s3 + $0x2f0] sm:$0xff]  ;;  %v1826_v11 = vld [vmem:[%s3444_s3 + $0x380] sm:$0xff] }
 0x12e   : > { %v1809_v6 = vld [vmem:[%s3444_s3 + $0x2f8] sm:$0xff] }
 0x12f   : > { %2421 = vmatpush3.bf16.msra.mxu1 %v2418_v49  ;;  %v1774_v49 = vld [vmem:[%s3444_s3 + $0x1e0] sm:$0xff] }
 0x130   : > { %2453 = vmatpush3.bf16.msra.mxu0 %v2450_v53  ;;  %2455 = vmatprep.subr.bf16.mxu1 %v2454_v62  ;;  %v2478_v53 = vpack.c.bf16 %v1759_v48, %v1758_v47  ;;  %v2510_v54 = vpack.c.bf16 %v1775_v51, %v1774_v49  ;;  %v1787_v47 = vld [vmem:[%s3444_s3 + $0x248] sm:$0xff]  ;;  %v1802_v48 = vld [vmem:[%s3444_s3 + $0x2c0] sm:$0xff] }
 0x131   : > { %2487 = vmatprep.subr.bf16.mxu0 %v2486_v1  ;;  %v1803_v49 = vld [vmem:[%s3444_s3 + $0x2c8] sm:$0xff] }
 0x132   : > { %2073 = vmatmul.mubr.f32.vlgmr.msra.gmra.mrb[0].mxu1 %v490_v8 }
 0x133   : > { %2457 = vmatpush3.bf16.msra.mxu1 %v2454_v62  ;;  %2111 = vmatmul.mubr.f32.vlgmr.msra.gmra.mrb[12].mxu0 %v3001_v52  ;;  %v2514_v62 = vpack.c.bf16 %v1777_v58, %v1776_v57  ;;  %v2570_v58 = vpack.c.bf16 %v1805_v56, %v1804_v55  ;;  %v1836_v55 = vld [vmem:[%s3444_s3 + $0x3d0] sm:$0xff] }
 0x134   : > { %2489 = vmatpush3.bf16.msra.mxu0 %v2486_v1  ;;  %2459 = vmatprep.subr.bf16.mxu1 %v2458_v12  ;;  %v1779_v1 = vld [vmem:[%s3444_s3 + $0x208] sm:$0xff] }
 0x135   : > { %2491 = vmatprep.subr.bf16.mxu0 %v2490_v13  ;;  %2075 = vmatprep.mubr.f32.mxu1 %v3050_v18  ;;  %v2518_v7 = vpack.c.bf16 %v1779_v1, %v1778_v63  ;;  %v1807_v63 = vld [vmem:[%s3444_s3 + $0x2e8] sm:$0xff] }
 0x136   : > { %2076 = vmatmul.mubr.f32.gmra.mrb[2].mxu1 %v3056_v21  ;;  %2113 = vmatprep.mubr.f32.mxu0 %v3016_v61 }
 0x137   : > { %2461 = vmatpush3.bf16.msra.mxu1 %v2458_v12  ;;  %2114 = vmatmul.mubr.f32.gmra.mrb[14].mxu0 %v3018_v0  ;;  %v856_v12 = vld [vmem:[#allocation2 + $0x60] sm:$0xff] }
 0x138   : > { %2493 = vmatpush3.bf16.msra.mxu0 %v2490_v13  ;;  %2463 = vmatprep.subr.bf16.mxu1 %v2462_v23  ;;  %v3139_v13 = vld [vmem:[#allocation2 + $0x68] sm:$0xff] }
 0x139   : > { %2495 = vmatprep.subr.bf16.mxu0 %v2494_v25  ;;  %2148 = vmatprep.mubr.f32.mxu1 %v731_v29  ;;  %v866_v26 = vrot.slane %v3139_v13, 7  ;;  %v1783_v29 = vld [vmem:[%s3444_s3 + $0x228] sm:$0xff] }
 0x13a   : > { %2186 = vmatprep.mubr.f32.mxu0 %v490_v8  ;;  %v476_v8 = vld [vmem:[#allocation2 + $0x58] sm:$0xff]  ;;  %v2526_v36 = vpack.c.bf16 %v1783_v29, %v1782_v28  ;;  %v1814_v28 = vld [vmem:[%s3444_s3 + $0x320] sm:$0xff]  ;;  %v1815_v29 = vld [vmem:[%s3444_s3 + $0x328] sm:$0xff] }
 0x13b   : > { %2465 = vmatpush3.bf16.msra.mxu1 %v2462_v23  ;;  %v726_v19 = vrot.slane %v476_v8, 1  ;;  %v1797_v23 = vld [vmem:[%s3444_s3 + $0x298] sm:$0xff]  ;;  %v2578_v8 = vpack.c.bf16 %v1809_v6, %v1808_v5 }
 0x13c   : > { %2497 = vmatpush3.bf16.msra.mxu0 %v2494_v25  ;;  %2467 = vmatprep.subr.bf16.mxu1 %v2466_v30  ;;  %v865_v25 = vrot.slane %v856_v12, 7  ;;  %v1827_v12 = vld [vmem:[%s3444_s3 + $0x388] sm:$0xff]  ;;  %v1841_v5 = vld [vmem:[%s3444_s3 + $0x3f8] sm:$0xff] }
 0x13d   : > { %2499 = vmatprep.subr.bf16.mxu0 %v2498_v31  ;;  %v3176_v33 = vsel %vm727_vm3, %v725_v17, %v726_v19  ;;  %v2614_v15 = vpack.c.bf16 %v1827_v12, %v1826_v11  ;;  %v1812_v17 = vld [vmem:[%s3444_s3 + $0x310] sm:$0xff]  ;;  %v1813_v19 = vld [vmem:[%s3444_s3 + $0x318] sm:$0xff]  ;;  %v1236_v12 = vld [vmem:[#allocation2 + $0x80] sm:$0xff] }
 0x13e   : > { %v3181_v34 = vsel %vm487_vm2, %v865_v25, %v866_v26  ;;  %v1105_v25 = vrot.slane %v3139_v13, 1  ;;  %v1235_v11 = vld [vmem:[#allocation2 + $0x78] sm:$0xff] }
 0x13f   : > { %2469 = vmatpush3.bf16.msra.mxu1 %v2466_v30  ;;  %v2554_v30 = vpack.c.bf16 %v1797_v23, %v1796_v20  ;;  %v1828_v20 = vld [vmem:[%s3444_s3 + $0x390] sm:$0xff]  ;;  %v1829_v23 = vld [vmem:[%s3444_s3 + $0x398] sm:$0xff] }
 0x140   : > { %2501 = vmatpush3.bf16.msra.mxu0 %v2498_v31  ;;  %2471 = vmatprep.subr.bf16.mxu1 %v2470_v37  ;;  %v1798_v31 = vld [vmem:[%s3444_s3 + $0x2a0] sm:$0xff] }
 0x141   : > { %2503 = vmatprep.subr.bf16.mxu0 %v2502_v38 }
 0x143   : > { %2473 = vmatpush3.bf16.msra.mxu1 %v2470_v37  ;;  %v2558_v37 = vpack.c.bf16 %v1799_v32, %v1798_v31  ;;  %v1830_v31 = vld [vmem:[%s3444_s3 + $0x3a0] sm:$0xff]  ;;  %v1831_v32 = vld [vmem:[%s3444_s3 + $0x3a8] sm:$0xff] }
 0x144   : > { %2505 = vmatpush3.bf16.msra.mxu0 %v2502_v38  ;;  %2475 = vmatprep.subr.bf16.mxu1 %v2474_v44  ;;  %v1784_v38 = vld [vmem:[%s3444_s3 + $0x230] sm:$0xff] }
 0x145   : > { %2507 = vmatprep.subr.bf16.mxu0 %v2506_v46  ;;  %v2530_v43 = vpack.c.bf16 %v1785_v39, %v1784_v38  ;;  %v2622_v38 = vpack.c.bf16 %v1831_v32, %v1830_v31  ;;  %v1816_v39 = vld [vmem:[%s3444_s3 + $0x330] sm:$0xff]  ;;  %v1854_v31 = vld [vmem:[%s3444_s3 + $0x460] sm:$0xff]  ;;  %v1855_v32 = vld [vmem:[%s3444_s3 + $0x468] sm:$0xff] }
 0x147   : > { %2477 = vmatpush3.bf16.msra.mxu1 %v2474_v44  ;;  %v2562_v44 = vpack.c.bf16 %v1801_v42, %v1800_v41  ;;  %v1817_v41 = vld [vmem:[%s3444_s3 + $0x338] sm:$0xff]  ;;  %v1832_v42 = vld [vmem:[%s3444_s3 + $0x3b0] sm:$0xff] }
 0x148   : > { %2509 = vmatpush3.bf16.msra.mxu0 %v2506_v46  ;;  %2479 = vmatprep.subr.bf16.mxu1 %v2478_v53  ;;  %v1786_v46 = vld [vmem:[%s3444_s3 + $0x240] sm:$0xff] }
 0x149   : > { %2511 = vmatprep.subr.bf16.mxu0 %v2510_v54  ;;  %v2534_v51 = vpack.c.bf16 %v1787_v47, %v1786_v46  ;;  %v1818_v47 = vld [vmem:[%s3444_s3 + $0x340] sm:$0xff] }
 0x14b   : > { %2481 = vmatpush3.bf16.msra.mxu1 %v2478_v53  ;;  %v2566_v53 = vpack.c.bf16 %v1803_v49, %v1802_v48  ;;  %v1819_v48 = vld [vmem:[%s3444_s3 + $0x348] sm:$0xff]  ;;  %v1834_v49 = vld [vmem:[%s3444_s3 + $0x3c0] sm:$0xff] }
 0x14c   : > { %2513 = vmatpush3.bf16.msra.mxu0 %v2510_v54  ;;  %2483 = vmatprep.subr.bf16.mxu1 %v2482_v59  ;;  %v1788_v54 = vld [vmem:[%s3444_s3 + $0x250] sm:$0xff] }
 0x14d   : > { %2515 = vmatprep.subr.bf16.mxu0 %v2514_v62 }
 0x14f   : > { %2485 = vmatpush3.bf16.msra.mxu1 %v2482_v59  ;;  %v1790_v59 = vld [vmem:[%s3444_s3 + $0x260] sm:$0xff] }
 0x150   : > { %2517 = vmatpush3.bf16.msra.mxu0 %v2514_v62  ;;  %2519 = vmatprep.subr.bf16.mxu1 %v2518_v7  ;;  %v1806_v62 = vld [vmem:[%s3444_s3 + $0x2e0] sm:$0xff]  ;;  %v2542_v1 = vpack.c.bf16 %v1791_v60, %v1790_v59  ;;  %v1823_v59 = vld [vmem:[%s3444_s3 + $0x368] sm:$0xff] }
 0x151   : > { %2551 = vmatprep.subr.bf16.mxu0 %v2550_v9  ;;  %v2574_v2 = vpack.c.bf16 %v1807_v63, %v1806_v62  ;;  %v1838_v60 = vld [vmem:[%s3444_s3 + $0x3e0] sm:$0xff]  ;;  %v1839_v62 = vld [vmem:[%s3444_s3 + $0x3e8] sm:$0xff] }
 0x152   : > { %2149 = vmatmul.mubr.f32.vlgmr.msra.gmra.mrb[4].mxu1 %v730_v16 }
 0x153   : > { %2521 = vmatpush3.bf16.msra.mxu1 %v2518_v7  ;;  %2187 = vmatmul.mubr.f32.vlgmr.msra.gmra.mrb[16].mxu0 %v3050_v18  ;;  %v2546_v7 = vpack.c.bf16 %v1793_v4, %v1792_v3  ;;  %v1825_v3 = vld [vmem:[%s3444_s3 + $0x378] sm:$0xff]  ;;  %v1840_v4 = vld [vmem:[%s3444_s3 + $0x3f0] sm:$0xff] }
 0x154   : > { %2151 = vmatprep.mubr.f32.mxu1 %v3159_v24  ;;  %2553 = vmatpush3.bf16.msra.mxu0 %v2550_v9  ;;  %v1810_v9 = vld [vmem:[%s3444_s3 + $0x300] sm:$0xff] }
 0x155   : > { %2523 = vmatprep.subr.bf16.mxu1 %v2522_v27  ;;  %2189 = vmatprep.mubr.f32.mxu0 %v3056_v21  ;;  %v2582_v14 = vpack.c.bf16 %v1811_v10, %v1810_v9  ;;  %v1843_v9 = vld [vmem:[%s3444_s3 + $0x408] sm:$0xff] }
 0x156   : > { %2152 = vmatmul.mubr.f32.gmra.mrb[6].mxu1 %v3176_v33  ;;  %2555 = vmatprep.subr.bf16.mxu0 %v2554_v30 }
 0x157   : > { %2525 = vmatpush3.bf16.msra.mxu1 %v2522_v27  ;;  %2190 = vmatmul.mubr.f32.gmra.mrb[18].mxu0 %v3181_v34  ;;  %v2586_v27 = vpack.c.bf16 %v1813_v19, %v1812_v17  ;;  %v1245_v17 = vrot.slane %v1236_v12, 7 }
 0x158   : > { %2557 = vmatpush3.bf16.msra.mxu0 %v2554_v30  ;;  %2527 = vmatprep.subr.bf16.mxu1 %v2526_v36  ;;  %v2618_v30 = vpack.c.bf16 %v1829_v23, %v1828_v20  ;;  %v1846_v20 = vld [vmem:[%s3444_s3 + $0x420] sm:$0xff]  ;;  %v1847_v23 = vld [vmem:[%s3444_s3 + $0x428] sm:$0xff] }
 0x159   : > { %2559 = vmatprep.subr.bf16.mxu0 %v2558_v37  ;;  %2224 = vmatprep.mubr.f32.mxu1 %v3001_v52  ;;  %v1789_v52 = vld [vmem:[%s3444_s3 + $0x258] sm:$0xff] }
 0x15a   : > { %2262 = vmatprep.mubr.f32.mxu0 %v730_v16  ;;  %v2538_v57 = vpack.c.bf16 %v1789_v52, %v1788_v54  ;;  %v858_v16 = vld [vmem:[#allocation2 + $0x70] sm:$0xff]  ;;  %v1821_v52 = vld [vmem:[%s3444_s3 + $0x358] sm:$0xff] }
 0x15b   : > { %2529 = vmatpush3.bf16.msra.mxu1 %v2526_v36  ;;  %v1106_v26 = vrot.slane %v858_v16, 1  ;;  %v1244_v16 = vrot.slane %v1235_v11, 7 }
 0x15c   : > { %2561 = vmatpush3.bf16.msra.mxu0 %v2558_v37  ;;  %2531 = vmatprep.subr.bf16.mxu1 %v2530_v43  ;;  %v2590_v37 = vpack.c.bf16 %v1815_v29, %v1814_v28  ;;  %v1852_v29 = vld [vmem:[%s3444_s3 + $0x450] sm:$0xff] }
 0x15d   : > { %2563 = vmatprep.subr.bf16.mxu0 %v2562_v44  ;;  %v3289_v36 = vsel %vm727_vm3, %v1105_v25, %v1106_v26  ;;  %v1246_v25 = vsel %vm487_vm2, %v1244_v16, %v1245_v17  ;;  %v2654_v26 = vpack.c.bf16 %v1847_v23, %v1846_v20 }
 0x15f   : > { %2533 = vmatpush3.bf16.msra.mxu1 %v2530_v43  ;;  %v1833_v43 = vld [vmem:[%s3444_s3 + $0x3b8] sm:$0xff] }
 0x160   : > { %2565 = vmatpush3.bf16.msra.mxu0 %v2562_v44  ;;  %2535 = vmatprep.subr.bf16.mxu1 %v2534_v51  ;;  %v2594_v44 = vpack.c.bf16 %v1817_v41, %v1816_v39  ;;  %v2626_v46 = vpack.c.bf16 %v1833_v43, %v1832_v42  ;;  %v1857_v39 = vld [vmem:[%s3444_s3 + $0x478] sm:$0xff]  ;;  %v1237_v42 = vld [vmem:[#allocation2 + $0x88] sm:$0xff]  ;;  %v1484_v43 = vrot.slane %v1236_v12, 1 }
 0x161   : > { %2567 = vmatprep.subr.bf16.mxu0 %v2566_v53 }
 0x163   : > { %2537 = vmatpush3.bf16.msra.mxu1 %v2534_v51  ;;  %v1835_v51 = vld [vmem:[%s3444_s3 + $0x3c8] sm:$0xff] }
 0x164   : > { %2569 = vmatpush3.bf16.msra.mxu0 %v2566_v53  ;;  %2539 = vmatprep.subr.bf16.mxu1 %v2538_v57  ;;  %v2598_v53 = vpack.c.bf16 %v1819_v48, %v1818_v47  ;;  %v2630_v54 = vpack.c.bf16 %v1835_v51, %v1834_v49  ;;  %v1729_v47 = vld [vmem:[%s3445_s4] ss:$0 sm:$0xff] }
 0x165   : > { %2571 = vmatprep.subr.bf16.mxu0 %v2570_v58  ;;  %v458_v48 = vadd.f32 %v1729_v47, %v2890_v40  ;;  %v457_v49 = vadd.f32 %v1729_v47, %v2888_v35  ;;  %v459_v22 = vadd.f32 %v1729_v47, %v2892_v45 }
 0x167   : > { %2541 = vmatpush3.bf16.msra.mxu1 %v2538_v57 }
 0x168   : > { %2573 = vmatpush3.bf16.msra.mxu0 %v2570_v58  ;;  %2543 = vmatprep.subr.bf16.mxu1 %v2542_v1  ;;  %v1822_v58 = vld [vmem:[%s3444_s3 + $0x360] sm:$0xff] }
 0x169   : > { %2575 = vmatprep.subr.bf16.mxu0 %v2574_v2  ;;  %v2606_v63 = vpack.c.bf16 %v1823_v59, %v1822_v58 }
 0x16b   : > { %2545 = vmatpush3.bf16.msra.mxu1 %v2542_v1  ;;  %v2638_v1 = vpack.c.bf16 %v1839_v62, %v1838_v60 }
 0x16c   : > { %2577 = vmatpush3.bf16.msra.mxu0 %v2574_v2  ;;  %2547 = vmatprep.subr.bf16.mxu1 %v2546_v7  ;;  %v1824_v2 = vld [vmem:[%s3444_s3 + $0x370] sm:$0xff] }
 0x16d   : > { %2579 = vmatprep.subr.bf16.mxu0 %v2578_v8  ;;  %v2610_v6 = vpack.c.bf16 %v1825_v3, %v1824_v2 }
 0x16f   : > { %2549 = vmatpush3.bf16.msra.mxu1 %v2546_v7  ;;  %v2642_v7 = vpack.c.bf16 %v1841_v5, %v1840_v4 }
 0x170   : > { %2581 = vmatpush3.bf16.msra.mxu0 %v2578_v8  ;;  %2583 = vmatprep.subr.bf16.mxu1 %v2582_v14  ;;  %v1842_v8 = vld [vmem:[%s3444_s3 + $0x400] sm:$0xff] }
 0x171   : > { %2615 = vmatprep.subr.bf16.mxu0 %v2614_v15  ;;  %v2646_v10 = vpack.c.bf16 %v1843_v9, %v1842_v8 }
 0x172   : > { %2225 = vmatmul.mubr.f32.vlgmr.msra.gmra.mrb[8].mxu1 %v3016_v61 }
 0x173   : > { %2585 = vmatpush3.bf16.msra.mxu1 %v2582_v14  ;;  %2263 = vmatmul.mubr.f32.vlgmr.msra.gmra.mrb[20].mxu0 %v3159_v24  ;;  %v1844_v14 = vld [vmem:[%s3444_s3 + $0x410] sm:$0xff] }
 0x174   : > { %2227 = vmatprep.mubr.f32.mxu1 %v3018_v0  ;;  %2617 = vmatpush3.bf16.msra.mxu0 %v2614_v15  ;;  %v1845_v15 = vld [vmem:[%s3444_s3 + $0x418] sm:$0xff] }
 0x175   : > { %2587 = vmatprep.subr.bf16.mxu1 %v2586_v27  ;;  %2265 = vmatprep.mubr.f32.mxu0 %v3176_v33  ;;  %v2650_v19 = vpack.c.bf16 %v1845_v15, %v1844_v14 }
 0x176   : > { %2228 = vmatmul.mubr.f32.gmra.mrb[10].mxu1 %v3139_v13  ;;  %2619 = vmatprep.subr.bf16.mxu0 %v2618_v30 }
 0x177   : > { %2589 = vmatpush3.bf16.msra.mxu1 %v2586_v27  ;;  %2266 = vmatmul.mubr.f32.gmra.mrb[22].mxu0 %v3289_v36  ;;  %v1848_v27 = vld [vmem:[%s3444_s3 + $0x430] sm:$0xff] }
 0x178   : > { %2621 = vmatpush3.bf16.msra.mxu0 %v2618_v30  ;;  %2591 = vmatprep.subr.bf16.mxu1 %v2590_v37  ;;  %v1853_v30 = vld [vmem:[%s3444_s3 + $0x458] sm:$0xff] }
 0x179   : > { %2623 = vmatprep.subr.bf16.mxu0 %v2622_v38  ;;  %2300 = vmatprep.mubr.f32.mxu1 %v3050_v18  ;;  %v1820_v18 = vld [vmem:[%s3444_s3 + $0x350] sm:$0xff] }
 0x17a   : > { %2338 = vmatprep.mubr.f32.mxu0 %v3016_v61  ;;  %v1837_v61 = vld [vmem:[%s3444_s3 + $0x3d8] sm:$0xff]  ;;  %v2602_v56 = vpack.c.bf16 %v1821_v52, %v1820_v18 }
 0x17b   : > { %2593 = vmatpush3.bf16.msra.mxu1 %v2590_v37  ;;  %v2634_v57 = vpack.c.bf16 %v1837_v61, %v1836_v55  ;;  %v2670_v37 = vpack.c.bf16 %v1855_v32, %v1854_v31 }
 0x17c   : > { %2625 = vmatpush3.bf16.msra.mxu0 %v2622_v38  ;;  %2595 = vmatprep.subr.bf16.mxu1 %v2594_v44  ;;  %v1856_v38 = vld [vmem:[%s3444_s3 + $0x470] sm:$0xff] }
 0x17d   : > { %2627 = vmatprep.subr.bf16.mxu0 %v2626_v46  ;;  %v2674_v41 = vpack.c.bf16 %v1857_v39, %v1856_v38 }
 0x17f   : > { %2597 = vmatpush3.bf16.msra.mxu1 %v2594_v44  ;;  %v1485_v44 = vrot.slane %v1237_v42, 1 }
 0x180   : > { %2629 = vmatpush3.bf16.msra.mxu0 %v2626_v46  ;;  %2599 = vmatprep.subr.bf16.mxu1 %v2598_v53 }
 0x181   : > { %2631 = vmatprep.subr.bf16.mxu0 %v2630_v54  ;;  %v1486_v46 = vsel %vm727_vm3, %v1484_v43, %v1485_v44 }
 0x183   : > { %2601 = vmatpush3.bf16.msra.mxu1 %v2598_v53 }
 0x184   : > { %2633 = vmatpush3.bf16.msra.mxu0 %v2630_v54  ;;  %2603 = vmatprep.subr.bf16.mxu1 %v2602_v56 }
 0x185   : > { %2635 = vmatprep.subr.bf16.mxu0 %v2634_v57 }
 0x187   : > { %2605 = vmatpush3.bf16.msra.mxu1 %v2602_v56 }
 0x188   : > { %2637 = vmatpush3.bf16.msra.mxu0 %v2634_v57  ;;  %2607 = vmatprep.subr.bf16.mxu1 %v2606_v63 }
 0x189   : > { %2639 = vmatprep.subr.bf16.mxu0 %v2638_v1 }
 0x18b   : > { %2609 = vmatpush3.bf16.msra.mxu1 %v2606_v63 }
 0x18c   : > { %2641 = vmatpush3.bf16.msra.mxu0 %v2638_v1  ;;  %2611 = vmatprep.subr.bf16.mxu1 %v2610_v6 }
 0x18d   : > { %2643 = vmatprep.subr.bf16.mxu0 %v2642_v7 }
 0x18f   : > { %2613 = vmatpush3.bf16.msra.mxu1 %v2610_v6 }
 0x190   : > { %2645 = vmatpush3.bf16.msra.mxu0 %v2642_v7  ;;  %2647 = vmatprep.subr.bf16.mxu1 %v2646_v10 }
 0x192   : > { %2301 = vmatmul.mubr.f32.vlgmr.msra.gmra.mrb[12].mxu1 %v3056_v21  ;;  %v1849_v21 = vld [vmem:[%s3444_s3 + $0x438] sm:$0xff] }
 0x193   : > { %2649 = vmatpush3.bf16.msra.mxu1 %v2646_v10  ;;  %2339 = vmatmul.mubr.f32.vlgmr.msra.gmra.mrb[24].mxu0 %v3018_v0  ;;  %v2658_v0 = vpack.c.bf16 %v1849_v21, %v1848_v27 }
 0x194   : > { %2303 = vmatprep.mubr.f32.mxu1 %v3181_v34  ;;  %2651 = vmatprep.subr.bf16.mxu1 %v2650_v19  ;;  %v1850_v34 = vld [vmem:[%s3444_s3 + $0x440] sm:$0xff] }
 0x195   : > { %2341 = vmatprep.mubr.f32.mxu0 %v3139_v13  ;;  %v1851_v13 = vld [vmem:[%s3444_s3 + $0x448] sm:$0xff] }
 0x196   : > { %2304 = vmatmul.mubr.f32.gmra.mrb[14].mxu1 %v1246_v25  ;;  %v2662_v28 = vpack.c.bf16 %v1851_v13, %v1850_v34 }
 0x197   : > { %2653 = vmatpush3.bf16.msra.mxu1 %v2650_v19  ;;  %2342 = vmatmul.mubr.f32.gmra.mrb[26].mxu0 %v1236_v12 }
 0x198   : > { %2655 = vmatprep.subr.bf16.mxu1 %v2654_v26  ;;  %2376 = vmatprep.mubr.f32.mxu1 %v3159_v24  ;;  %v2666_v24 = vpack.c.bf16 %v1853_v30, %v1852_v29 }
 0x19b   : > { %2657 = vmatpush3.bf16.msra.mxu1 %v2654_v26 }
 0x19c   : > { %2659 = vmatprep.subr.bf16.mxu1 %v2658_v0 }
 0x19f   : > { %2661 = vmatpush3.bf16.msra.mxu1 %v2658_v0 }
 0x1a0   : > { %2663 = vmatprep.subr.bf16.mxu1 %v2662_v28 }
 0x1a3   : > { %2665 = vmatpush3.bf16.msra.mxu1 %v2662_v28 }
 0x1a4   : > { %2667 = vmatprep.subr.bf16.mxu1 %v2666_v24 }
 0x1a7   : > { %2669 = vmatpush3.bf16.msra.mxu1 %v2666_v24 }
 0x1a8   : > { %2671 = vmatprep.subr.bf16.mxu1 %v2670_v37 }
 0x1ab   : > { %2673 = vmatpush3.bf16.msra.mxu1 %v2670_v37 }
 0x1ac   : > { %2675 = vmatprep.subr.bf16.mxu1 %v2674_v41 }
 0x1af   : > { %2677 = vmatpush3.bf16.msra.mxu1 %v2674_v41 }
 0x1b2   : > { %2377 = vmatmul.mubr.f32.vlgmr.msra.gmra.mrb[16].mxu1 %v3176_v33  ;;  %v460_v33 = vadd.f32 %v1729_v47, %v2894_v50 }
 0x1b3   : > { %2379 = vmatprep.mubr.f32.mxu1 %v3289_v36 }
 0x1b6   : > { %2380 = vmatmul.mubr.f32.gmra.mrb[18].mxu1 %v1486_v46 }
 0x205   : > { %v2074_v51 = vpop.f32.mrb[0].mxu1 }
 0x206   : > { %v598_v53 = vadd.f32 %v2074_v51, %v458_v48  ;;  %v578_v54 = vpop.f32.mrb[1].mxu1  ;;  %v2112_v18 = vpop.f32.mrb[12].mxu0 }
 0x207   : > { %v597_v52 = vadd.f32 %v578_v54, %v457_v49  ;;  %v692_v36 = vpop.f32.mrb[13].mxu0 }
 0x208   : > { %v712_v55 = vadd.f32 %v2112_v18, %v598_v53 }
 0x209   : > { %v711_v61 = vadd.f32 %v692_v36, %v597_v52  ;;  %v2077_v56 = vpop.f32.mrb[2].mxu1 }
 0x20a   : > { %v600_v57 = vadd.f32 %v2077_v56, %v460_v33  ;;  %v588_v58 = vpop.f32.mrb[3].mxu1  ;;  %v2115_v59 = vpop.f32.mrb[14].mxu0 }
 0x20b   : > { %v599_v60 = vadd.f32 %v588_v58, %v459_v22  ;;  %v702_v40 = vpop.f32.mrb[15].mxu0 }
 0x20c   : > { %v714_v62 = vadd.f32 %v2115_v59, %v600_v57 }
 0x20d   : > { %v713_v35 = vadd.f32 %v702_v40, %v599_v60 }
 0x225   : > { %v2150_v63 = vpop.f32.mrb[4].mxu1 }
 0x226   : > { %v839_v1 = vadd.f32 %v2150_v63, %v712_v55  ;;  %v819_v2 = vpop.f32.mrb[5].mxu1  ;;  %v2188_v3 = vpop.f32.mrb[16].mxu0 }
 0x227   : > { %v838_v4 = vadd.f32 %v819_v2, %v711_v61  ;;  %v958_v50 = vpop.f32.mrb[17].mxu0 }
 0x228   : > { %v978_v5 = vadd.f32 %v2188_v3, %v839_v1 }
 0x229   : > { %v977_v6 = vadd.f32 %v958_v50, %v838_v4  ;;  %v2153_v7 = vpop.f32.mrb[6].mxu1 }
 0x22a   : > { %v841_v45 = vadd.f32 %v2153_v7, %v714_v62  ;;  %v829_v8 = vpop.f32.mrb[7].mxu1  ;;  %v2191_v9 = vpop.f32.mrb[18].mxu0 }
 0x22b   : > { %v840_v10 = vadd.f32 %v829_v8, %v713_v35  ;;  %v968_v11 = vpop.f32.mrb[19].mxu0 }
 0x22c   : > { %v980_v12 = vadd.f32 %v2191_v9, %v841_v45 }
 0x22d   : > { %v979_v14 = vadd.f32 %v968_v11, %v840_v10 }
 0x245   : > { %v2226_v15 = vpop.f32.mrb[8].mxu1 }
 0x246   : > { %v1092_v16 = vadd.f32 %v2226_v15, %v978_v5  ;;  %v1072_v17 = vpop.f32.mrb[9].mxu1  ;;  %v2264_v19 = vpop.f32.mrb[20].mxu0 }
 0x247   : > { %v1091_v20 = vadd.f32 %v1072_v17, %v977_v6  ;;  %v1198_v23 = vpop.f32.mrb[21].mxu0 }
 0x248   : > { %v1218_v25 = vadd.f32 %v2264_v19, %v1092_v16 }
 0x249   : > { %v1217_v26 = vadd.f32 %v1198_v23, %v1091_v20  ;;  %v2229_v27 = vpop.f32.mrb[10].mxu1 }
 0x24a   : > { %v1094_v21 = vadd.f32 %v2229_v27, %v980_v12  ;;  %v1082_v0 = vpop.f32.mrb[11].mxu1  ;;  %v2267_v34 = vpop.f32.mrb[22].mxu0 }
 0x24b   : > { %v1093_v13 = vadd.f32 %v1082_v0, %v979_v14  ;;  %v1208_v28 = vpop.f32.mrb[23].mxu0 }
 0x24c   : > { %v1220_v29 = vadd.f32 %v2267_v34, %v1094_v21 }
 0x24d   : > { %v1219_v30 = vadd.f32 %v1208_v28, %v1093_v13 }
 0x265   : > { %v2302_v24 = vpop.f32.mrb[12].mxu1 }
 0x266   : > { %v1357_v31 = vadd.f32 %v2302_v24, %v1218_v25  ;;  %v1337_v32 = vpop.f32.mrb[13].mxu1  ;;  %v2340_v37 = vpop.f32.mrb[24].mxu0 }
 0x267   : > { %v1356_v38 = vadd.f32 %v1337_v32, %v1217_v26  ;;  %v1451_v39 = vpop.f32.mrb[25].mxu0 }
 0x268   : > { %v1471_v41 = vadd.f32 %v2340_v37, %v1357_v31 }
 0x269   : > { %v1470_v42 = vadd.f32 %v1451_v39, %v1356_v38  ;;  %v2305_v43 = vpop.f32.mrb[14].mxu1 }
 0x26a   : > { %v1359_v44 = vadd.f32 %v2305_v43, %v1220_v29  ;;  %v1347_v46 = vpop.f32.mrb[15].mxu1  ;;  %v2343_v47 = vpop.f32.mrb[26].mxu0 }
 0x26b   : > { %v1358_v48 = vadd.f32 %v1347_v46, %v1219_v30  ;;  %v1461_v49 = vpop.f32.mrb[27].mxu0 }
 0x26c   : > { %v1473_v51 = vadd.f32 %v2343_v47, %v1359_v44 }
 0x26d   : > { %v1472_v53 = vadd.f32 %v1461_v49, %v1358_v48 }
 0x285   : > { %v2378_v54 = vpop.f32.mrb[16].mxu1 }
 0x286   : > { %v1597_v18 = vadd.f32 %v2378_v54, %v1471_v41  ;;  %v1577_v33 = vpop.f32.mrb[17].mxu1 }
 0x287   : > { %v1596_v52 = vadd.f32 %v1577_v33, %v1470_v42 }
 0x288   : > { %v1609_v36 = vmax.f32 %v1597_v18, 0.0 }
 0x289   : > { %v1608_v22 = vmax.f32 %v1596_v52, 0.0  ;;  %v2381_v55 = vpop.f32.mrb[18].mxu1 }
 0x28a   : > { %1614 = vst.msk [vmem:[%s2873_s16 + $0x8] sm:$0xff] %vm1612_vm4, %v1609_v36  ;;  %v1599_v61 = vadd.f32 %v2381_v55, %v1473_v51  ;;  %v1587_v56 = vpop.f32.mrb[19].mxu1 }
 0x28b   : > { %1613 = vst.msk [vmem:[%s2873_s16] sm:$0xff] %vm1612_vm4, %v1608_v22  ;;  %v1598_v57 = vadd.f32 %v1587_v56, %v1472_v53 }
 0x28c   : > { %v1611_v58 = vmax.f32 %v1599_v61, 0.0 }
 0x28d   : > { %v1610_v59 = vmax.f32 %v1598_v57, 0.0 }
 0x28e   : > { %1616 = vst.msk [vmem:[%s2873_s16 + $0x18] sm:$0xff] %vm1612_vm4, %v1611_v58 }
 0x28f   : > { %1615 = vst.msk [vmem:[%s2873_s16 + $0x10] sm:$0xff] %vm1612_vm4, %v1610_v59 }
 0x290 PF: > { %s15_s22 = sadd.s32 1, %s2761_s22   ;;  %s3447_s18 = smov %s2753_s20 }
 0x291   : > { %p12_p10 = scmp.ge.s32.totalorder %s15_s22, 6   ;;  %s3448_s19 = smov %s2757_s21 }
 0x292   : > { %s3449_s20 = smov %s3452_s23  ;;  %s3450_s21 = smov %s3456_s24 }
 0x293   :  { %14 = sbr.rel (!%p12_p10) target bundleno = 3 (0x3), region = 89 }

</bundles_post_ra>
